<compile_context>
chip_gen: v7x
topology: tpu7x:2x2x1
jax: 0.10.0
libtpu: 0.0.40
codegen_flags: <defaults>
</compile_context>

<pallas_src>
import functools

import jax
import jax.numpy as jnp
from jax import lax
from jax.experimental import pallas as pl
from jax.experimental.pallas import tpu as pltpu


# ---------------------------------------------------------------------------
# Kernel builder: fused conv (tap-decomposed) + bias + ReLU.
# ---------------------------------------------------------------------------
def _make_conv_kernel(k, stride, dilation, wo, row_tile, r_list, has_act):
    """Builds the kernel body.

    Ref layout (in order):
      x_row_refs[len(r_list)] : (1, 1, Wp, Cin)        bf16, one padded input row each
      w_ref                   : (K*K, Cin, Cout_pad)   bf16, BN-scale-folded weights
      b_ref                   : (1, Cout_pad)          f32, folded bias
      o_ref                   : (1, row_tile, Wo, Cout_pad) f32
    """
    n_rows = len(r_list)

    def kernel(*refs):
        x_refs = refs[:n_rows]
        w_ref = refs[n_rows]
        b_ref = refs[n_rows + 1]
        o_ref = refs[n_rows + 2]

        # Pre-slice the K horizontal taps of every needed input row: (Wo, Cin) bf16.
        taps = {}
        for i, r in enumerate(r_list):
            for kx in range(k):
                c0 = kx * dilation
                if stride == 1:
                    w_idx = pl.ds(c0, wo)
                else:
                    w_idx = pl.ds(c0, wo, stride)
                taps[(r, kx)] = x_refs[i][0, 0, w_idx, :]

        bias = b_ref[0]                                    # (Cout_pad,) f32

        for j in range(row_tile):                          # output row within tile
            acc = None
            for ky in range(k):
                r = j * stride + ky * dilation             # relative padded input row
                for kx in range(k):
                    d = jnp.dot(taps[(r, kx)], w_ref[ky * k + kx],
                                preferred_element_type=jnp.float32)
                    acc = d if acc is None else acc + d
            y = acc + bias
            if has_act:
                y = jnp.maximum(y, 0.0)
            o_ref[0, j] = y.astype(o_ref.dtype)

    return kernel


# ---------------------------------------------------------------------------
# NHWC core (preferred entry point when the surrounding model is NHWC).
# ---------------------------------------------------------------------------
def conv_bn_act_block_nhwc(x_nhwc, weight, bn_gamma, bn_beta, bn_mean, bn_var,
                           *, stride=1, padding=1, dilation=1,
                           has_bn=True, has_act=True, conv_bias=None,
                           eps=1e-5, row_tile=4):
    """Fused Conv2d -> BatchNorm2d(inference) -> ReLU.  NHWC in / NHWC out.

    x_nhwc:  (N, H, W, Cin)
    weight:  (Cout, Cin, K, K)  (PyTorch OIHW layout)
    returns: (N, Ho, Wo, Cout) float32
    """
    f32 = jnp.float32
    n, h, w, cin = x_nhwc.shape
    cout, cin_w, k, k2 = weight.shape
    if cin_w != cin:
        raise NotImplementedError("groups != 1 not supported")  # TODO(synk): grouped conv
    assert k == k2, "only square kernels supported"

    eff_k = (k - 1) * dilation + 1
    ho = (h + 2 * padding - eff_k) // stride + 1
    wo = (w + 2 * padding - eff_k) // stride + 1
    assert ho >= 1 and wo >= 1

    # ---- fold BN (inference mode) into per-output-channel scale / bias ------
    if has_bn:
        scale = bn_gamma.astype(f32) / jnp.sqrt(bn_var.astype(f32) + eps)
        bias = bn_beta.astype(f32) - bn_mean.astype(f32) * scale
        if conv_bias is not None:
            bias = bias + conv_bias.astype(f32) * scale
    else:
        scale = jnp.ones((cout,), f32)
        bias = conv_bias.astype(f32) if conv_bias is not None else jnp.zeros((cout,), f32)

    # ---- weights: OIHW -> (K*K, Cin, Cout), scale folded, bf16, Cout padded --
    cp = ((cout + 127) // 128) * 128                       # lane-dense output channels
    w_taps = jnp.transpose(weight.astype(f32), (2, 3, 1, 0)).reshape(k * k, cin, cout)
    w_taps = w_taps * scale[None, None, :]
    if cp != cout:
        w_taps = jnp.pad(w_taps, ((0, 0), (0, 0), (0, cp - cout)))
        bias = jnp.pad(bias, (0, cp - cout))
    w_taps = w_taps.astype(jnp.bfloat16)
    bias2d = bias.reshape(1, cp).astype(f32)

    # ---- activations: spatial zero-pad once, bf16 ----------------------------
    x_pad = jnp.pad(x_nhwc, ((0, 0), (padding, padding), (padding, padding), (0, 0)))
    x_pad = x_pad.astype(jnp.bfloat16)
    wp = w + 2 * padding

    # ---- output-row tiling ----------------------------------------------------
    row_tile = max(1, min(row_tile, ho))
    while ho % row_tile:                                   # pick a divisor of Ho
        row_tile -= 1

    # Padded-input rows needed per tile, relative to the tile's base row.
    r_list = sorted({j * stride + ky * dilation
                     for j in range(row_tile) for ky in range(k)})

    kernel = _make_conv_kernel(k, stride, dilation, wo, row_tile, r_list, has_act)

    def row_spec(r):
        # H-block of size 1 => block index == element row index, so each tap row
        # can be addressed at an arbitrary (stride/dilation) offset.
        return pl.BlockSpec(
            (1, 1, wp, cin),
            lambda ni, ti, r=r: (ni, ti * row_tile * stride + r, 0, 0))

    in_specs = [row_spec(r) for r in r_list]
    in_specs.append(pl.BlockSpec((k * k, cin, cp), lambda ni, ti: (0, 0, 0)))  # weights
    in_specs.append(pl.BlockSpec((1, cp), lambda ni, ti: (0, 0)))              # bias

    out_nhwc = pl.pallas_call(
        kernel,
        out_shape=jax.ShapeDtypeStruct((n, ho, wo, cp), jnp.float32),
        grid=(n, ho // row_tile),
        in_specs=in_specs,
        out_specs=pl.BlockSpec((1, row_tile, wo, cp),
                               lambda ni, ti: (ni, ti, 0, 0)),
        compiler_params=pltpu.CompilerParams(
            dimension_semantics=("parallel", "parallel")),
    )(*([x_pad] * len(r_list)), w_taps, bias2d)

    return out_nhwc[..., :cout]


# ---------------------------------------------------------------------------
# PyTorch-layout wrapper (NCHW in / NCHW out). Transposes are boundary glue.
# ---------------------------------------------------------------------------
def conv_bn_act_block(x_nchw, weight, bn_gamma, bn_beta, bn_mean, bn_var, **kw):
    x_nhwc = jnp.transpose(x_nchw, (0, 2, 3, 1))
    out_nhwc = conv_bn_act_block_nhwc(x_nhwc, weight, bn_gamma, bn_beta,
                                      bn_mean, bn_var, **kw)
    return jnp.transpose(out_nhwc, (0, 3, 1, 2))


# ---------------------------------------------------------------------------
# Reference (plain JAX / XLA) mirroring the kernel's numerics
# (BN scale folded into weights, operands rounded to bf16, f32 accumulation).
# ---------------------------------------------------------------------------
def _reference(x, weight, gamma, beta, mean, var, *, stride, padding, dilation,
               has_bn, has_act, conv_bias=None, eps=1e-5):
    f32 = jnp.float32
    cout = weight.shape[0]
    if has_bn:
        scale = gamma / jnp.sqrt(var + eps)
        bias = beta - mean * scale
        if conv_bias is not None:
            bias = bias + conv_bias * scale
    else:
        scale = jnp.ones((cout,), f32)
        bias = conv_bias if conv_bias is not None else jnp.zeros((cout,), f32)
    w_eff = (weight * scale[:, None, None, None]).astype(jnp.bfloat16).astype(f32)
    x_eff = x.astype(jnp.bfloat16).astype(f32)
    out = lax.conv_general_dilated(
        x_eff, w_eff,
        window_strides=(stride, stride),
        padding=((padding, padding), (padding, padding)),
        rhs_dilation=(dilation, dilation),
        dimension_numbers=("NCHW", "OIHW", "NCHW"),
        precision=lax.Precision.HIGHEST)
    out = out + bias[None, :, None, None]
    if has_act:
        out = jnp.maximum(out, 0.0)
    return out


if __name__ == "__main__":
    # ConvBnActBlock(inplanes=4, planes=8, kernel_size=3, stride=1, padding=1,
    #                groups=1, dilation=1, has_bn=True, has_act=True)
    inplanes, planes, ksize = 4, 8, 3
    stride, padding, dilation = 1, 1, 1
    has_bn, has_act = True, True

    key = jax.random.PRNGKey(0)
    k_x, k_w, k_g, k_b = jax.random.split(key, 4)

    x = jax.random.normal(k_x, (2, inplanes, 16, 16), dtype=jnp.float32)
    weight = 0.1 * jax.random.normal(k_w, (planes, inplanes, ksize, ksize), dtype=jnp.float32)
    bn_gamma = 1.0 + 0.05 * jax.random.normal(k_g, (planes,), dtype=jnp.float32)
    bn_beta = 0.05 * jax.random.normal(k_b, (planes,), dtype=jnp.float32)
    bn_mean = jnp.zeros((planes,), jnp.float32)   # PyTorch default running stats
    bn_var = jnp.ones((planes,), jnp.float32)

    fwd = jax.jit(functools.partial(
        conv_bn_act_block, stride=stride, padding=padding, dilation=dilation,
        has_bn=has_bn, has_act=has_act))

    out = jax.block_until_ready(fwd(x, weight, bn_gamma, bn_beta, bn_mean, bn_var))

    ref = jax.block_until_ready(_reference(
        x, weight, bn_gamma, bn_beta, bn_mean, bn_var,
        stride=stride, padding=padding, dilation=dilation,
        has_bn=has_bn, has_act=has_act))

    assert out.shape == (2, planes, 16, 16), out.shape
    max_err = float(jnp.max(jnp.abs(out - ref)))
    assert jnp.allclose(out, ref, atol=1e-4, rtol=1e-4), max_err

    print("KERNEL_OK")
</pallas_src>

<mosaic_0001>
module attributes {stable_mosaic.version = 11 : i64} {
  func.func @kernel(%arg0: i32, %arg1: i32, %arg2: memref<1x1x18x4xbf16, #tpu.memory_space<vmem>>, %arg3: memref<1x1x18x4xbf16, #tpu.memory_space<vmem>>, %arg4: memref<1x1x18x4xbf16, #tpu.memory_space<vmem>>, %arg5: memref<1x1x18x4xbf16, #tpu.memory_space<vmem>>, %arg6: memref<1x1x18x4xbf16, #tpu.memory_space<vmem>>, %arg7: memref<1x1x18x4xbf16, #tpu.memory_space<vmem>>, %arg8: memref<9x4x128xbf16, #tpu.memory_space<vmem>>, %arg9: memref<1x128xf32, #tpu.memory_space<vmem>>, %arg10: memref<1x4x16x128xf32, #tpu.memory_space<vmem>>) attributes {dimension_semantics = [#tpu.dimension_semantics<parallel>, #tpu.dimension_semantics<parallel>], iteration_bounds = array<i64: 2, 4>, scalar_prefetch = 0 : i64, scratch_operands = 0 : i64, tpu.core_type = #tpu.core_type<tc>, window_params = [{transform_indices = @transform_0, window_bounds = array<i64: 1, 1, 18, 4>}, {transform_indices = @transform_1, window_bounds = array<i64: 1, 1, 18, 4>}, {transform_indices = @transform_2, window_bounds = array<i64: 1, 1, 18, 4>}, {transform_indices = @transform_3, window_bounds = array<i64: 1, 1, 18, 4>}, {transform_indices = @transform_4, window_bounds = array<i64: 1, 1, 18, 4>}, {transform_indices = @transform_5, window_bounds = array<i64: 1, 1, 18, 4>}, {pipeline_mode = #tpu.pipeline_mode<synchronous>, transform_indices = @transform_6, window_bounds = array<i64: 9, 4, 128>}, {pipeline_mode = #tpu.pipeline_mode<synchronous>, transform_indices = @transform_7, window_bounds = array<i64: 1, 128>}, {transform_indices = @transform_8, window_bounds = array<i64: 1, 4, 16, 128>}]} {
    %c0 = arith.constant 0 : index
    %c0_0 = arith.constant 0 : index
    %c0_1 = arith.constant 0 : index
    %c0_2 = arith.constant 0 : index
    %0 = vector.load %arg2[%c0, %c0_0, %c0_1, %c0_2] : memref<1x1x18x4xbf16, #tpu.memory_space<vmem>>, vector<1x1x16x4xbf16>
    %1 = vector.shape_cast %0 : vector<1x1x16x4xbf16> to vector<16x4xbf16>
    %c0_3 = arith.constant 0 : index
    %c0_4 = arith.constant 0 : index
    %c1 = arith.constant 1 : index
    %c0_5 = arith.constant 0 : index
    %2 = vector.load %arg2[%c0_3, %c0_4, %c1, %c0_5] : memref<1x1x18x4xbf16, #tpu.memory_space<vmem>>, vector<1x1x16x4xbf16>
    %3 = vector.shape_cast %2 : vector<1x1x16x4xbf16> to vector<16x4xbf16>
    %c0_6 = arith.constant 0 : index
    %c0_7 = arith.constant 0 : index
    %c2 = arith.constant 2 : index
    %c0_8 = arith.constant 0 : index
    %4 = vector.load %arg2[%c0_6, %c0_7, %c2, %c0_8] : memref<1x1x18x4xbf16, #tpu.memory_space<vmem>>, vector<1x1x16x4xbf16>
    %5 = vector.shape_cast %4 : vector<1x1x16x4xbf16> to vector<16x4xbf16>
    %c0_9 = arith.constant 0 : index
    %c0_10 = arith.constant 0 : index
    %c0_11 = arith.constant 0 : index
    %c0_12 = arith.constant 0 : index
    %6 = vector.load %arg3[%c0_9, %c0_10, %c0_11, %c0_12] : memref<1x1x18x4xbf16, #tpu.memory_space<vmem>>, vector<1x1x16x4xbf16>
    %7 = vector.shape_cast %6 : vector<1x1x16x4xbf16> to vector<16x4xbf16>
    %c0_13 = arith.constant 0 : index
    %c0_14 = arith.constant 0 : index
    %c1_15 = arith.constant 1 : index
    %c0_16 = arith.constant 0 : index
    %8 = vector.load %arg3[%c0_13, %c0_14, %c1_15, %c0_16] : memref<1x1x18x4xbf16, #tpu.memory_space<vmem>>, vector<1x1x16x4xbf16>
    %9 = vector.shape_cast %8 : vector<1x1x16x4xbf16> to vector<16x4xbf16>
    %c0_17 = arith.constant 0 : index
    %c0_18 = arith.constant 0 : index
    %c2_19 = arith.constant 2 : index
    %c0_20 = arith.constant 0 : index
    %10 = vector.load %arg3[%c0_17, %c0_18, %c2_19, %c0_20] : memref<1x1x18x4xbf16, #tpu.memory_space<vmem>>, vector<1x1x16x4xbf16>
    %11 = vector.shape_cast %10 : vector<1x1x16x4xbf16> to vector<16x4xbf16>
    %c0_21 = arith.constant 0 : index
    %c0_22 = arith.constant 0 : index
    %c0_23 = arith.constant 0 : index
    %c0_24 = arith.constant 0 : index
    %12 = vector.load %arg4[%c0_21, %c0_22, %c0_23, %c0_24] : memref<1x1x18x4xbf16, #tpu.memory_space<vmem>>, vector<1x1x16x4xbf16>
    %13 = vector.shape_cast %12 : vector<1x1x16x4xbf16> to vector<16x4xbf16>
    %c0_25 = arith.constant 0 : index
    %c0_26 = arith.constant 0 : index
    %c1_27 = arith.constant 1 : index
    %c0_28 = arith.constant 0 : index
    %14 = vector.load %arg4[%c0_25, %c0_26, %c1_27, %c0_28] : memref<1x1x18x4xbf16, #tpu.memory_space<vmem>>, vector<1x1x16x4xbf16>
    %15 = vector.shape_cast %14 : vector<1x1x16x4xbf16> to vector<16x4xbf16>
    %c0_29 = arith.constant 0 : index
    %c0_30 = arith.constant 0 : index
    %c2_31 = arith.constant 2 : index
    %c0_32 = arith.constant 0 : index
    %16 = vector.load %arg4[%c0_29, %c0_30, %c2_31, %c0_32] : memref<1x1x18x4xbf16, #tpu.memory_space<vmem>>, vector<1x1x16x4xbf16>
    %17 = vector.shape_cast %16 : vector<1x1x16x4xbf16> to vector<16x4xbf16>
    %c0_33 = arith.constant 0 : index
    %c0_34 = arith.constant 0 : index
    %c0_35 = arith.constant 0 : index
    %c0_36 = arith.constant 0 : index
    %18 = vector.load %arg5[%c0_33, %c0_34, %c0_35, %c0_36] : memref<1x1x18x4xbf16, #tpu.memory_space<vmem>>, vector<1x1x16x4xbf16>
    %19 = vector.shape_cast %18 : vector<1x1x16x4xbf16> to vector<16x4xbf16>
    %c0_37 = arith.constant 0 : index
    %c0_38 = arith.constant 0 : index
    %c1_39 = arith.constant 1 : index
    %c0_40 = arith.constant 0 : index
    %20 = vector.load %arg5[%c0_37, %c0_38, %c1_39, %c0_40] : memref<1x1x18x4xbf16, #tpu.memory_space<vmem>>, vector<1x1x16x4xbf16>
    %21 = vector.shape_cast %20 : vector<1x1x16x4xbf16> to vector<16x4xbf16>
    %c0_41 = arith.constant 0 : index
    %c0_42 = arith.constant 0 : index
    %c2_43 = arith.constant 2 : index
    %c0_44 = arith.constant 0 : index
    %22 = vector.load %arg5[%c0_41, %c0_42, %c2_43, %c0_44] : memref<1x1x18x4xbf16, #tpu.memory_space<vmem>>, vector<1x1x16x4xbf16>
    %23 = vector.shape_cast %22 : vector<1x1x16x4xbf16> to vector<16x4xbf16>
    %c0_45 = arith.constant 0 : index
    %c0_46 = arith.constant 0 : index
    %c0_47 = arith.constant 0 : index
    %c0_48 = arith.constant 0 : index
    %24 = vector.load %arg6[%c0_45, %c0_46, %c0_47, %c0_48] : memref<1x1x18x4xbf16, #tpu.memory_space<vmem>>, vector<1x1x16x4xbf16>
    %25 = vector.shape_cast %24 : vector<1x1x16x4xbf16> to vector<16x4xbf16>
    %c0_49 = arith.constant 0 : index
    %c0_50 = arith.constant 0 : index
    %c1_51 = arith.constant 1 : index
    %c0_52 = arith.constant 0 : index
    %26 = vector.load %arg6[%c0_49, %c0_50, %c1_51, %c0_52] : memref<1x1x18x4xbf16, #tpu.memory_space<vmem>>, vector<1x1x16x4xbf16>
    %27 = vector.shape_cast %26 : vector<1x1x16x4xbf16> to vector<16x4xbf16>
    %c0_53 = arith.constant 0 : index
    %c0_54 = arith.constant 0 : index
    %c2_55 = arith.constant 2 : index
    %c0_56 = arith.constant 0 : index
    %28 = vector.load %arg6[%c0_53, %c0_54, %c2_55, %c0_56] : memref<1x1x18x4xbf16, #tpu.memory_space<vmem>>, vector<1x1x16x4xbf16>
    %29 = vector.shape_cast %28 : vector<1x1x16x4xbf16> to vector<16x4xbf16>
    %c0_57 = arith.constant 0 : index
    %c0_58 = arith.constant 0 : index
    %c0_59 = arith.constant 0 : index
    %c0_60 = arith.constant 0 : index
    %30 = vector.load %arg7[%c0_57, %c0_58, %c0_59, %c0_60] : memref<1x1x18x4xbf16, #tpu.memory_space<vmem>>, vector<1x1x16x4xbf16>
    %31 = vector.shape_cast %30 : vector<1x1x16x4xbf16> to vector<16x4xbf16>
    %c0_61 = arith.constant 0 : index
    %c0_62 = arith.constant 0 : index
    %c1_63 = arith.constant 1 : index
    %c0_64 = arith.constant 0 : index
    %32 = vector.load %arg7[%c0_61, %c0_62, %c1_63, %c0_64] : memref<1x1x18x4xbf16, #tpu.memory_space<vmem>>, vector<1x1x16x4xbf16>
    %33 = vector.shape_cast %32 : vector<1x1x16x4xbf16> to vector<16x4xbf16>
    %c0_65 = arith.constant 0 : index
    %c0_66 = arith.constant 0 : index
    %c2_67 = arith.constant 2 : index
    %c0_68 = arith.constant 0 : index
    %34 = vector.load %arg7[%c0_65, %c0_66, %c2_67, %c0_68] : memref<1x1x18x4xbf16, #tpu.memory_space<vmem>>, vector<1x1x16x4xbf16>
    %35 = vector.shape_cast %34 : vector<1x1x16x4xbf16> to vector<16x4xbf16>
    %c0_69 = arith.constant 0 : index
    %c0_70 = arith.constant 0 : index
    %36 = vector.load %arg9[%c0_69, %c0_70] : memref<1x128xf32, #tpu.memory_space<vmem>>, vector<1x128xf32>
    %37 = vector.shape_cast %36 : vector<1x128xf32> to vector<128xf32>
    %c0_71 = arith.constant 0 : index
    %c0_72 = arith.constant 0 : index
    %c0_73 = arith.constant 0 : index
    %38 = vector.load %arg8[%c0_71, %c0_72, %c0_73] : memref<9x4x128xbf16, #tpu.memory_space<vmem>>, vector<1x4x128xbf16>
    %39 = vector.shape_cast %38 : vector<1x4x128xbf16> to vector<4x128xbf16>
    %cst = arith.constant dense<0.000000e+00> : vector<16x128xf32>
    %40 = tpu.matmul %1, %39, %cst {dimension_numbers = #tpu.dot_dimension_numbers<[1], [0], [0], [1], [0, 0, 1, 1], [], []>} : vector<16x4xbf16>, vector<4x128xbf16>, vector<16x128xf32> -> vector<16x128xf32>
    %c1_74 = arith.constant 1 : index
    %c0_75 = arith.constant 0 : index
    %c0_76 = arith.constant 0 : index
    %41 = vector.load %arg8[%c1_74, %c0_75, %c0_76] : memref<9x4x128xbf16, #tpu.memory_space<vmem>>, vector<1x4x128xbf16>
    %42 = vector.shape_cast %41 : vector<1x4x128xbf16> to vector<4x128xbf16>
    %cst_77 = arith.constant dense<0.000000e+00> : vector<16x128xf32>
    %43 = tpu.matmul %3, %42, %cst_77 {dimension_numbers = #tpu.dot_dimension_numbers<[1], [0], [0], [1], [0, 0, 1, 1], [], []>} : vector<16x4xbf16>, vector<4x128xbf16>, vector<16x128xf32> -> vector<16x128xf32>
    %44 = arith.addf %40, %43 : vector<16x128xf32>
    %c2_78 = arith.constant 2 : index
    %c0_79 = arith.constant 0 : index
    %c0_80 = arith.constant 0 : index
    %45 = vector.load %arg8[%c2_78, %c0_79, %c0_80] : memref<9x4x128xbf16, #tpu.memory_space<vmem>>, vector<1x4x128xbf16>
    %46 = vector.shape_cast %45 : vector<1x4x128xbf16> to vector<4x128xbf16>
    %cst_81 = arith.constant dense<0.000000e+00> : vector<16x128xf32>
    %47 = tpu.matmul %5, %46, %cst_81 {dimension_numbers = #tpu.dot_dimension_numbers<[1], [0], [0], [1], [0, 0, 1, 1], [], []>} : vector<16x4xbf16>, vector<4x128xbf16>, vector<16x128xf32> -> vector<16x128xf32>
    %48 = arith.addf %44, %47 : vector<16x128xf32>
    %c3 = arith.constant 3 : index
    %c0_82 = arith.constant 0 : index
    %c0_83 = arith.constant 0 : index
    %49 = vector.load %arg8[%c3, %c0_82, %c0_83] : memref<9x4x128xbf16, #tpu.memory_space<vmem>>, vector<1x4x128xbf16>
    %50 = vector.shape_cast %49 : vector<1x4x128xbf16> to vector<4x128xbf16>
    %cst_84 = arith.constant dense<0.000000e+00> : vector<16x128xf32>
    %51 = tpu.matmul %7, %50, %cst_84 {dimension_numbers = #tpu.dot_dimension_numbers<[1], [0], [0], [1], [0, 0, 1, 1], [], []>} : vector<16x4xbf16>, vector<4x128xbf16>, vector<16x128xf32> -> vector<16x128xf32>
    %52 = arith.addf %48, %51 : vector<16x128xf32>
    %c4 = arith.constant 4 : index
    %c0_85 = arith.constant 0 : index
    %c0_86 = arith.constant 0 : index
    %53 = vector.load %arg8[%c4, %c0_85, %c0_86] : memref<9x4x128xbf16, #tpu.memory_space<vmem>>, vector<1x4x128xbf16>
    %54 = vector.shape_cast %53 : vector<1x4x128xbf16> to vector<4x128xbf16>
    %cst_87 = arith.constant dense<0.000000e+00> : vector<16x128xf32>
    %55 = tpu.matmul %9, %54, %cst_87 {dimension_numbers = #tpu.dot_dimension_numbers<[1], [0], [0], [1], [0, 0, 1, 1], [], []>} : vector<16x4xbf16>, vector<4x128xbf16>, vector<16x128xf32> -> vector<16x128xf32>
    %56 = arith.addf %52, %55 : vector<16x128xf32>
    %c5 = arith.constant 5 : index
    %c0_88 = arith.constant 0 : index
    %c0_89 = arith.constant 0 : index
    %57 = vector.load %arg8[%c5, %c0_88, %c0_89] : memref<9x4x128xbf16, #tpu.memory_space<vmem>>, vector<1x4x128xbf16>
    %58 = vector.shape_cast %57 : vector<1x4x128xbf16> to vector<4x128xbf16>
    %cst_90 = arith.constant dense<0.000000e+00> : vector<16x128xf32>
    %59 = tpu.matmul %11, %58, %cst_90 {dimension_numbers = #tpu.dot_dimension_numbers<[1], [0], [0], [1], [0, 0, 1, 1], [], []>} : vector<16x4xbf16>, vector<4x128xbf16>, vector<16x128xf32> -> vector<16x128xf32>
    %60 = arith.addf %56, %59 : vector<16x128xf32>
    %c6 = arith.constant 6 : index
    %c0_91 = arith.constant 0 : index
    %c0_92 = arith.constant 0 : index
    %61 = vector.load %arg8[%c6, %c0_91, %c0_92] : memref<9x4x128xbf16, #tpu.memory_space<vmem>>, vector<1x4x128xbf16>
    %62 = vector.shape_cast %61 : vector<1x4x128xbf16> to vector<4x128xbf16>
    %cst_93 = arith.constant dense<0.000000e+00> : vector<16x128xf32>
    %63 = tpu.matmul %13, %62, %cst_93 {dimension_numbers = #tpu.dot_dimension_numbers<[1], [0], [0], [1], [0, 0, 1, 1], [], []>} : vector<16x4xbf16>, vector<4x128xbf16>, vector<16x128xf32> -> vector<16x128xf32>
    %64 = arith.addf %60, %63 : vector<16x128xf32>
    %c7 = arith.constant 7 : index
    %c0_94 = arith.constant 0 : index
    %c0_95 = arith.constant 0 : index
    %65 = vector.load %arg8[%c7, %c0_94, %c0_95] : memref<9x4x128xbf16, #tpu.memory_space<vmem>>, vector<1x4x128xbf16>
    %66 = vector.shape_cast %65 : vector<1x4x128xbf16> to vector<4x128xbf16>
    %cst_96 = arith.constant dense<0.000000e+00> : vector<16x128xf32>
    %67 = tpu.matmul %15, %66, %cst_96 {dimension_numbers = #tpu.dot_dimension_numbers<[1], [0], [0], [1], [0, 0, 1, 1], [], []>} : vector<16x4xbf16>, vector<4x128xbf16>, vector<16x128xf32> -> vector<16x128xf32>
    %68 = arith.addf %64, %67 : vector<16x128xf32>
    %c8 = arith.constant 8 : index
    %c0_97 = arith.constant 0 : index
    %c0_98 = arith.constant 0 : index
    %69 = vector.load %arg8[%c8, %c0_97, %c0_98] : memref<9x4x128xbf16, #tpu.memory_space<vmem>>, vector<1x4x128xbf16>
    %70 = vector.shape_cast %69 : vector<1x4x128xbf16> to vector<4x128xbf16>
    %cst_99 = arith.constant dense<0.000000e+00> : vector<16x128xf32>
    %71 = tpu.matmul %17, %70, %cst_99 {dimension_numbers = #tpu.dot_dimension_numbers<[1], [0], [0], [1], [0, 0, 1, 1], [], []>} : vector<16x4xbf16>, vector<4x128xbf16>, vector<16x128xf32> -> vector<16x128xf32>
    %72 = arith.addf %68, %71 : vector<16x128xf32>
    %73 = vector.shape_cast %37 : vector<128xf32> to vector<1x128xf32>
    %74 = vector.broadcast %73 : vector<1x128xf32> to vector<16x128xf32>
    %75 = arith.addf %72, %74 : vector<16x128xf32>
    %cst_100 = arith.constant 0.000000e+00 : f32
    %76 = vector.broadcast %cst_100 : f32 to vector<16x128xf32>
    %77 = arith.maximumf %75, %76 : vector<16x128xf32>
    %c0_101 = arith.constant 0 : index
    %c0_102 = arith.constant 0 : index
    %c0_103 = arith.constant 0 : index
    %c0_104 = arith.constant 0 : index
    %78 = vector.load %arg10[%c0_101, %c0_102, %c0_103, %c0_104] : memref<1x4x16x128xf32, #tpu.memory_space<vmem>>, vector<1x1x16x128xf32>
    %79 = vector.shape_cast %78 : vector<1x1x16x128xf32> to vector<16x128xf32>
    %80 = vector.shape_cast %77 : vector<16x128xf32> to vector<1x1x16x128xf32>
    tpu.vector_store %arg10[%c0_101, %c0_102, %c0_103, %c0_104], %80 {strides = array<i32>} : memref<1x4x16x128xf32, #tpu.memory_space<vmem>>, vector<1x1x16x128xf32>,
    %c0_105 = arith.constant 0 : index
    %c0_106 = arith.constant 0 : index
    %c0_107 = arith.constant 0 : index
    %81 = vector.load %arg8[%c0_105, %c0_106, %c0_107] : memref<9x4x128xbf16, #tpu.memory_space<vmem>>, vector<1x4x128xbf16>
    %82 = vector.shape_cast %81 : vector<1x4x128xbf16> to vector<4x128xbf16>
    %cst_108 = arith.constant dense<0.000000e+00> : vector<16x128xf32>
    %83 = tpu.matmul %7, %82, %cst_108 {dimension_numbers = #tpu.dot_dimension_numbers<[1], [0], [0], [1], [0, 0, 1, 1], [], []>} : vector<16x4xbf16>, vector<4x128xbf16>, vector<16x128xf32> -> vector<16x128xf32>
    %c1_109 = arith.constant 1 : index
    %c0_110 = arith.constant 0 : index
    %c0_111 = arith.constant 0 : index
    %84 = vector.load %arg8[%c1_109, %c0_110, %c0_111] : memref<9x4x128xbf16, #tpu.memory_space<vmem>>, vector<1x4x128xbf16>
    %85 = vector.shape_cast %84 : vector<1x4x128xbf16> to vector<4x128xbf16>
    %cst_112 = arith.constant dense<0.000000e+00> : vector<16x128xf32>
    %86 = tpu.matmul %9, %85, %cst_112 {dimension_numbers = #tpu.dot_dimension_numbers<[1], [0], [0], [1], [0, 0, 1, 1], [], []>} : vector<16x4xbf16>, vector<4x128xbf16>, vector<16x128xf32> -> vector<16x128xf32>
    %87 = arith.addf %83, %86 : vector<16x128xf32>
    %c2_113 = arith.constant 2 : index
    %c0_114 = arith.constant 0 : index
    %c0_115 = arith.constant 0 : index
    %88 = vector.load %arg8[%c2_113, %c0_114, %c0_115] : memref<9x4x128xbf16, #tpu.memory_space<vmem>>, vector<1x4x128xbf16>
    %89 = vector.shape_cast %88 : vector<1x4x128xbf16> to vector<4x128xbf16>
    %cst_116 = arith.constant dense<0.000000e+00> : vector<16x128xf32>
    %90 = tpu.matmul %11, %89, %cst_116 {dimension_numbers = #tpu.dot_dimension_numbers<[1], [0], [0], [1], [0, 0, 1, 1], [], []>} : vector<16x4xbf16>, vector<4x128xbf16>, vector<16x128xf32> -> vector<16x128xf32>
    %91 = arith.addf %87, %90 : vector<16x128xf32>
    %c3_117 = arith.constant 3 : index
    %c0_118 = arith.constant 0 : index
    %c0_119 = arith.constant 0 : index
    %92 = vector.load %arg8[%c3_117, %c0_118, %c0_119] : memref<9x4x128xbf16, #tpu.memory_space<vmem>>, vector<1x4x128xbf16>
    %93 = vector.shape_cast %92 : vector<1x4x128xbf16> to vector<4x128xbf16>
    %cst_120 = arith.constant dense<0.000000e+00> : vector<16x128xf32>
    %94 = tpu.matmul %13, %93, %cst_120 {dimension_numbers = #tpu.dot_dimension_numbers<[1], [0], [0], [1], [0, 0, 1, 1], [], []>} : vector<16x4xbf16>, vector<4x128xbf16>, vector<16x128xf32> -> vector<16x128xf32>
    %95 = arith.addf %91, %94 : vector<16x128xf32>
    %c4_121 = arith.constant 4 : index
    %c0_122 = arith.constant 0 : index
    %c0_123 = arith.constant 0 : index
    %96 = vector.load %arg8[%c4_121, %c0_122, %c0_123] : memref<9x4x128xbf16, #tpu.memory_space<vmem>>, vector<1x4x128xbf16>
    %97 = vector.shape_cast %96 : vector<1x4x128xbf16> to vector<4x128xbf16>
    %cst_124 = arith.constant dense<0.000000e+00> : vector<16x128xf32>
    %98 = tpu.matmul %15, %97, %cst_124 {dimension_numbers = #tpu.dot_dimension_numbers<[1], [0], [0], [1], [0, 0, 1, 1], [], []>} : vector<16x4xbf16>, vector<4x128xbf16>, vector<16x128xf32> -> vector<16x128xf32>
    %99 = arith.addf %95, %98 : vector<16x128xf32>
    %c5_125 = arith.constant 5 : index
    %c0_126 = arith.constant 0 : index
    %c0_127 = arith.constant 0 : index
    %100 = vector.load %arg8[%c5_125, %c0_126, %c0_127] : memref<9x4x128xbf16, #tpu.memory_space<vmem>>, vector<1x4x128xbf16>
    %101 = vector.shape_cast %100 : vector<1x4x128xbf16> to vector<4x128xbf16>
    %cst_128 = arith.constant dense<0.000000e+00> : vector<16x128xf32>
    %102 = tpu.matmul %17, %101, %cst_128 {dimension_numbers = #tpu.dot_dimension_numbers<[1], [0], [0], [1], [0, 0, 1, 1], [], []>} : vector<16x4xbf16>, vector<4x128xbf16>, vector<16x128xf32> -> vector<16x128xf32>
    %103 = arith.addf %99, %102 : vector<16x128xf32>
    %c6_129 = arith.constant 6 : index
    %c0_130 = arith.constant 0 : index
    %c0_131 = arith.constant 0 : index
    %104 = vector.load %arg8[%c6_129, %c0_130, %c0_131] : memref<9x4x128xbf16, #tpu.memory_space<vmem>>, vector<1x4x128xbf16>
    %105 = vector.shape_cast %104 : vector<1x4x128xbf16> to vector<4x128xbf16>
    %cst_132 = arith.constant dense<0.000000e+00> : vector<16x128xf32>
    %106 = tpu.matmul %19, %105, %cst_132 {dimension_numbers = #tpu.dot_dimension_numbers<[1], [0], [0], [1], [0, 0, 1, 1], [], []>} : vector<16x4xbf16>, vector<4x128xbf16>, vector<16x128xf32> -> vector<16x128xf32>
    %107 = arith.addf %103, %106 : vector<16x128xf32>
    %c7_133 = arith.constant 7 : index
    %c0_134 = arith.constant 0 : index
    %c0_135 = arith.constant 0 : index
    %108 = vector.load %arg8[%c7_133, %c0_134, %c0_135] : memref<9x4x128xbf16, #tpu.memory_space<vmem>>, vector<1x4x128xbf16>
    %109 = vector.shape_cast %108 : vector<1x4x128xbf16> to vector<4x128xbf16>
    %cst_136 = arith.constant dense<0.000000e+00> : vector<16x128xf32>
    %110 = tpu.matmul %21, %109, %cst_136 {dimension_numbers = #tpu.dot_dimension_numbers<[1], [0], [0], [1], [0, 0, 1, 1], [], []>} : vector<16x4xbf16>, vector<4x128xbf16>, vector<16x128xf32> -> vector<16x128xf32>
    %111 = arith.addf %107, %110 : vector<16x128xf32>
    %c8_137 = arith.constant 8 : index
    %c0_138 = arith.constant 0 : index
    %c0_139 = arith.constant 0 : index
    %112 = vector.load %arg8[%c8_137, %c0_138, %c0_139] : memref<9x4x128xbf16, #tpu.memory_space<vmem>>, vector<1x4x128xbf16>
    %113 = vector.shape_cast %112 : vector<1x4x128xbf16> to vector<4x128xbf16>
    %cst_140 = arith.constant dense<0.000000e+00> : vector<16x128xf32>
    %114 = tpu.matmul %23, %113, %cst_140 {dimension_numbers = #tpu.dot_dimension_numbers<[1], [0], [0], [1], [0, 0, 1, 1], [], []>} : vector<16x4xbf16>, vector<4x128xbf16>, vector<16x128xf32> -> vector<16x128xf32>
    %115 = arith.addf %111, %114 : vector<16x128xf32>
    %116 = vector.shape_cast %37 : vector<128xf32> to vector<1x128xf32>
    %117 = vector.broadcast %116 : vector<1x128xf32> to vector<16x128xf32>
    %118 = arith.addf %115, %117 : vector<16x128xf32>
    %cst_141 = arith.constant 0.000000e+00 : f32
    %119 = vector.broadcast %cst_141 : f32 to vector<16x128xf32>
    %120 = arith.maximumf %118, %119 : vector<16x128xf32>
    %c0_142 = arith.constant 0 : index
    %c1_143 = arith.constant 1 : index
    %c0_144 = arith.constant 0 : index
    %c0_145 = arith.constant 0 : index
    %121 = vector.load %arg10[%c0_142, %c1_143, %c0_144, %c0_145] : memref<1x4x16x128xf32, #tpu.memory_space<vmem>>, vector<1x1x16x128xf32>
    %122 = vector.shape_cast %121 : vector<1x1x16x128xf32> to vector<16x128xf32>
    %123 = vector.shape_cast %120 : vector<16x128xf32> to vector<1x1x16x128xf32>
    tpu.vector_store %arg10[%c0_142, %c1_143, %c0_144, %c0_145], %123 {strides = array<i32>} : memref<1x4x16x128xf32, #tpu.memory_space<vmem>>, vector<1x1x16x128xf32>,
    %c0_146 = arith.constant 0 : index
    %c0_147 = arith.constant 0 : index
    %c0_148 = arith.constant 0 : index
    %124 = vector.load %arg8[%c0_146, %c0_147, %c0_148] : memref<9x4x128xbf16, #tpu.memory_space<vmem>>, vector<1x4x128xbf16>
    %125 = vector.shape_cast %124 : vector<1x4x128xbf16> to vector<4x128xbf16>
    %cst_149 = arith.constant dense<0.000000e+00> : vector<16x128xf32>
    %126 = tpu.matmul %13, %125, %cst_149 {dimension_numbers = #tpu.dot_dimension_numbers<[1], [0], [0], [1], [0, 0, 1, 1], [], []>} : vector<16x4xbf16>, vector<4x128xbf16>, vector<16x128xf32> -> vector<16x128xf32>
    %c1_150 = arith.constant 1 : index
    %c0_151 = arith.constant 0 : index
    %c0_152 = arith.constant 0 : index
    %127 = vector.load %arg8[%c1_150, %c0_151, %c0_152] : memref<9x4x128xbf16, #tpu.memory_space<vmem>>, vector<1x4x128xbf16>
    %128 = vector.shape_cast %127 : vector<1x4x128xbf16> to vector<4x128xbf16>
    %cst_153 = arith.constant dense<0.000000e+00> : vector<16x128xf32>
    %129 = tpu.matmul %15, %128, %cst_153 {dimension_numbers = #tpu.dot_dimension_numbers<[1], [0], [0], [1], [0, 0, 1, 1], [], []>} : vector<16x4xbf16>, vector<4x128xbf16>, vector<16x128xf32> -> vector<16x128xf32>
    %130 = arith.addf %126, %129 : vector<16x128xf32>
    %c2_154 = arith.constant 2 : index
    %c0_155 = arith.constant 0 : index
    %c0_156 = arith.constant 0 : index
    %131 = vector.load %arg8[%c2_154, %c0_155, %c0_156] : memref<9x4x128xbf16, #tpu.memory_space<vmem>>, vector<1x4x128xbf16>
    %132 = vector.shape_cast %131 : vector<1x4x128xbf16> to vector<4x128xbf16>
    %cst_157 = arith.constant dense<0.000000e+00> : vector<16x128xf32>
    %133 = tpu.matmul %17, %132, %cst_157 {dimension_numbers = #tpu.dot_dimension_numbers<[1], [0], [0], [1], [0, 0, 1, 1], [], []>} : vector<16x4xbf16>, vector<4x128xbf16>, vector<16x128xf32> -> vector<16x128xf32>
    %134 = arith.addf %130, %133 : vector<16x128xf32>
    %c3_158 = arith.constant 3 : index
    %c0_159 = arith.constant 0 : index
    %c0_160 = arith.constant 0 : index
    %135 = vector.load %arg8[%c3_158, %c0_159, %c0_160] : memref<9x4x128xbf16, #tpu.memory_space<vmem>>, vector<1x4x128xbf16>
    %136 = vector.shape_cast %135 : vector<1x4x128xbf16> to vector<4x128xbf16>
    %cst_161 = arith.constant dense<0.000000e+00> : vector<16x128xf32>
    %137 = tpu.matmul %19, %136, %cst_161 {dimension_numbers = #tpu.dot_dimension_numbers<[1], [0], [0], [1], [0, 0, 1, 1], [], []>} : vector<16x4xbf16>, vector<4x128xbf16>, vector<16x128xf32> -> vector<16x128xf32>
    %138 = arith.addf %134, %137 : vector<16x128xf32>
    %c4_162 = arith.constant 4 : index
    %c0_163 = arith.constant 0 : index
    %c0_164 = arith.constant 0 : index
    %139 = vector.load %arg8[%c4_162, %c0_163, %c0_164] : memref<9x4x128xbf16, #tpu.memory_space<vmem>>, vector<1x4x128xbf16>
    %140 = vector.shape_cast %139 : vector<1x4x128xbf16> to vector<4x128xbf16>
    %cst_165 = arith.constant dense<0.000000e+00> : vector<16x128xf32>
    %141 = tpu.matmul %21, %140, %cst_165 {dimension_numbers = #tpu.dot_dimension_numbers<[1], [0], [0], [1], [0, 0, 1, 1], [], []>} : vector<16x4xbf16>, vector<4x128xbf16>, vector<16x128xf32> -> vector<16x128xf32>
    %142 = arith.addf %138, %141 : vector<16x128xf32>
    %c5_166 = arith.constant 5 : index
    %c0_167 = arith.constant 0 : index
    %c0_168 = arith.constant 0 : index
    %143 = vector.load %arg8[%c5_166, %c0_167, %c0_168] : memref<9x4x128xbf16, #tpu.memory_space<vmem>>, vector<1x4x128xbf16>
    %144 = vector.shape_cast %143 : vector<1x4x128xbf16> to vector<4x128xbf16>
    %cst_169 = arith.constant dense<0.000000e+00> : vector<16x128xf32>
    %145 = tpu.matmul %23, %144, %cst_169 {dimension_numbers = #tpu.dot_dimension_numbers<[1], [0], [0], [1], [0, 0, 1, 1], [], []>} : vector<16x4xbf16>, vector<4x128xbf16>, vector<16x128xf32> -> vector<16x128xf32>
    %146 = arith.addf %142, %145 : vector<16x128xf32>
    %c6_170 = arith.constant 6 : index
    %c0_171 = arith.constant 0 : index
    %c0_172 = arith.constant 0 : index
    %147 = vector.load %arg8[%c6_170, %c0_171, %c0_172] : memref<9x4x128xbf16, #tpu.memory_space<vmem>>, vector<1x4x128xbf16>
    %148 = vector.shape_cast %147 : vector<1x4x128xbf16> to vector<4x128xbf16>
    %cst_173 = arith.constant dense<0.000000e+00> : vector<16x128xf32>
    %149 = tpu.matmul %25, %148, %cst_173 {dimension_numbers = #tpu.dot_dimension_numbers<[1], [0], [0], [1], [0, 0, 1, 1], [], []>} : vector<16x4xbf16>, vector<4x128xbf16>, vector<16x128xf32> -> vector<16x128xf32>
    %150 = arith.addf %146, %149 : vector<16x128xf32>
    %c7_174 = arith.constant 7 : index
    %c0_175 = arith.constant 0 : index
    %c0_176 = arith.constant 0 : index
    %151 = vector.load %arg8[%c7_174, %c0_175, %c0_176] : memref<9x4x128xbf16, #tpu.memory_space<vmem>>, vector<1x4x128xbf16>
    %152 = vector.shape_cast %151 : vector<1x4x128xbf16> to vector<4x128xbf16>
    %cst_177 = arith.constant dense<0.000000e+00> : vector<16x128xf32>
    %153 = tpu.matmul %27, %152, %cst_177 {dimension_numbers = #tpu.dot_dimension_numbers<[1], [0], [0], [1], [0, 0, 1, 1], [], []>} : vector<16x4xbf16>, vector<4x128xbf16>, vector<16x128xf32> -> vector<16x128xf32>
    %154 = arith.addf %150, %153 : vector<16x128xf32>
    %c8_178 = arith.constant 8 : index
    %c0_179 = arith.constant 0 : index
    %c0_180 = arith.constant 0 : index
    %155 = vector.load %arg8[%c8_178, %c0_179, %c0_180] : memref<9x4x128xbf16, #tpu.memory_space<vmem>>, vector<1x4x128xbf16>
    %156 = vector.shape_cast %155 : vector<1x4x128xbf16> to vector<4x128xbf16>
    %cst_181 = arith.constant dense<0.000000e+00> : vector<16x128xf32>
    %157 = tpu.matmul %29, %156, %cst_181 {dimension_numbers = #tpu.dot_dimension_numbers<[1], [0], [0], [1], [0, 0, 1, 1], [], []>} : vector<16x4xbf16>, vector<4x128xbf16>, vector<16x128xf32> -> vector<16x128xf32>
    %158 = arith.addf %154, %157 : vector<16x128xf32>
    %159 = vector.shape_cast %37 : vector<128xf32> to vector<1x128xf32>
    %160 = vector.broadcast %159 : vector<1x128xf32> to vector<16x128xf32>
    %161 = arith.addf %158, %160 : vector<16x128xf32>
    %cst_182 = arith.constant 0.000000e+00 : f32
    %162 = vector.broadcast %cst_182 : f32 to vector<16x128xf32>
    %163 = arith.maximumf %161, %162 : vector<16x128xf32>
    %c0_183 = arith.constant 0 : index
    %c2_184 = arith.constant 2 : index
    %c0_185 = arith.constant 0 : index
    %c0_186 = arith.constant 0 : index
    %164 = vector.load %arg10[%c0_183, %c2_184, %c0_185, %c0_186] : memref<1x4x16x128xf32, #tpu.memory_space<vmem>>, vector<1x1x16x128xf32>
    %165 = vector.shape_cast %164 : vector<1x1x16x128xf32> to vector<16x128xf32>
    %166 = vector.shape_cast %163 : vector<16x128xf32> to vector<1x1x16x128xf32>
    tpu.vector_store %arg10[%c0_183, %c2_184, %c0_185, %c0_186], %166 {strides = array<i32>} : memref<1x4x16x128xf32, #tpu.memory_space<vmem>>, vector<1x1x16x128xf32>,
    %c0_187 = arith.constant 0 : index
    %c0_188 = arith.constant 0 : index
    %c0_189 = arith.constant 0 : index
    %167 = vector.load %arg8[%c0_187, %c0_188, %c0_189] : memref<9x4x128xbf16, #tpu.memory_space<vmem>>, vector<1x4x128xbf16>
    %168 = vector.shape_cast %167 : vector<1x4x128xbf16> to vector<4x128xbf16>
    %cst_190 = arith.constant dense<0.000000e+00> : vector<16x128xf32>
    %169 = tpu.matmul %19, %168, %cst_190 {dimension_numbers = #tpu.dot_dimension_numbers<[1], [0], [0], [1], [0, 0, 1, 1], [], []>} : vector<16x4xbf16>, vector<4x128xbf16>, vector<16x128xf32> -> vector<16x128xf32>
    %c1_191 = arith.constant 1 : index
    %c0_192 = arith.constant 0 : index
    %c0_193 = arith.constant 0 : index
    %170 = vector.load %arg8[%c1_191, %c0_192, %c0_193] : memref<9x4x128xbf16, #tpu.memory_space<vmem>>, vector<1x4x128xbf16>
    %171 = vector.shape_cast %170 : vector<1x4x128xbf16> to vector<4x128xbf16>
    %cst_194 = arith.constant dense<0.000000e+00> : vector<16x128xf32>
    %172 = tpu.matmul %21, %171, %cst_194 {dimension_numbers = #tpu.dot_dimension_numbers<[1], [0], [0], [1], [0, 0, 1, 1], [], []>} : vector<16x4xbf16>, vector<4x128xbf16>, vector<16x128xf32> -> vector<16x128xf32>
    %173 = arith.addf %169, %172 : vector<16x128xf32>
    %c2_195 = arith.constant 2 : index
    %c0_196 = arith.constant 0 : index
    %c0_197 = arith.constant 0 : index
    %174 = vector.load %arg8[%c2_195, %c0_196, %c0_197] : memref<9x4x128xbf16, #tpu.memory_space<vmem>>, vector<1x4x128xbf16>
    %175 = vector.shape_cast %174 : vector<1x4x128xbf16> to vector<4x128xbf16>
    %cst_198 = arith.constant dense<0.000000e+00> : vector<16x128xf32>
    %176 = tpu.matmul %23, %175, %cst_198 {dimension_numbers = #tpu.dot_dimension_numbers<[1], [0], [0], [1], [0, 0, 1, 1], [], []>} : vector<16x4xbf16>, vector<4x128xbf16>, vector<16x128xf32> -> vector<16x128xf32>
    %177 = arith.addf %173, %176 : vector<16x128xf32>
    %c3_199 = arith.constant 3 : index
    %c0_200 = arith.constant 0 : index
    %c0_201 = arith.constant 0 : index
    %178 = vector.load %arg8[%c3_199, %c0_200, %c0_201] : memref<9x4x128xbf16, #tpu.memory_space<vmem>>, vector<1x4x128xbf16>
    %179 = vector.shape_cast %178 : vector<1x4x128xbf16> to vector<4x128xbf16>
    %cst_202 = arith.constant dense<0.000000e+00> : vector<16x128xf32>
    %180 = tpu.matmul %25, %179, %cst_202 {dimension_numbers = #tpu.dot_dimension_numbers<[1], [0], [0], [1], [0, 0, 1, 1], [], []>} : vector<16x4xbf16>, vector<4x128xbf16>, vector<16x128xf32> -> vector<16x128xf32>
    %181 = arith.addf %177, %180 : vector<16x128xf32>
    %c4_203 = arith.constant 4 : index
    %c0_204 = arith.constant 0 : index
    %c0_205 = arith.constant 0 : index
    %182 = vector.load %arg8[%c4_203, %c0_204, %c0_205] : memref<9x4x128xbf16, #tpu.memory_space<vmem>>, vector<1x4x128xbf16>
    %183 = vector.shape_cast %182 : vector<1x4x128xbf16> to vector<4x128xbf16>
    %cst_206 = arith.constant dense<0.000000e+00> : vector<16x128xf32>
    %184 = tpu.matmul %27, %183, %cst_206 {dimension_numbers = #tpu.dot_dimension_numbers<[1], [0], [0], [1], [0, 0, 1, 1], [], []>} : vector<16x4xbf16>, vector<4x128xbf16>, vector<16x128xf32> -> vector<16x128xf32>
    %185 = arith.addf %181, %184 : vector<16x128xf32>
    %c5_207 = arith.constant 5 : index
    %c0_208 = arith.constant 0 : index
    %c0_209 = arith.constant 0 : index
    %186 = vector.load %arg8[%c5_207, %c0_208, %c0_209] : memref<9x4x128xbf16, #tpu.memory_space<vmem>>, vector<1x4x128xbf16>
    %187 = vector.shape_cast %186 : vector<1x4x128xbf16> to vector<4x128xbf16>
    %cst_210 = arith.constant dense<0.000000e+00> : vector<16x128xf32>
    %188 = tpu.matmul %29, %187, %cst_210 {dimension_numbers = #tpu.dot_dimension_numbers<[1], [0], [0], [1], [0, 0, 1, 1], [], []>} : vector<16x4xbf16>, vector<4x128xbf16>, vector<16x128xf32> -> vector<16x128xf32>
    %189 = arith.addf %185, %188 : vector<16x128xf32>
    %c6_211 = arith.constant 6 : index
    %c0_212 = arith.constant 0 : index
    %c0_213 = arith.constant 0 : index
    %190 = vector.load %arg8[%c6_211, %c0_212, %c0_213] : memref<9x4x128xbf16, #tpu.memory_space<vmem>>, vector<1x4x128xbf16>
    %191 = vector.shape_cast %190 : vector<1x4x128xbf16> to vector<4x128xbf16>
    %cst_214 = arith.constant dense<0.000000e+00> : vector<16x128xf32>
    %192 = tpu.matmul %31, %191, %cst_214 {dimension_numbers = #tpu.dot_dimension_numbers<[1], [0], [0], [1], [0, 0, 1, 1], [], []>} : vector<16x4xbf16>, vector<4x128xbf16>, vector<16x128xf32> -> vector<16x128xf32>
    %193 = arith.addf %189, %192 : vector<16x128xf32>
    %c7_215 = arith.constant 7 : index
    %c0_216 = arith.constant 0 : index
    %c0_217 = arith.constant 0 : index
    %194 = vector.load %arg8[%c7_215, %c0_216, %c0_217] : memref<9x4x128xbf16, #tpu.memory_space<vmem>>, vector<1x4x128xbf16>
    %195 = vector.shape_cast %194 : vector<1x4x128xbf16> to vector<4x128xbf16>
    %cst_218 = arith.constant dense<0.000000e+00> : vector<16x128xf32>
    %196 = tpu.matmul %33, %195, %cst_218 {dimension_numbers = #tpu.dot_dimension_numbers<[1], [0], [0], [1], [0, 0, 1, 1], [], []>} : vector<16x4xbf16>, vector<4x128xbf16>, vector<16x128xf32> -> vector<16x128xf32>
    %197 = arith.addf %193, %196 : vector<16x128xf32>
    %c8_219 = arith.constant 8 : index
    %c0_220 = arith.constant 0 : index
    %c0_221 = arith.constant 0 : index
    %198 = vector.load %arg8[%c8_219, %c0_220, %c0_221] : memref<9x4x128xbf16, #tpu.memory_space<vmem>>, vector<1x4x128xbf16>
    %199 = vector.shape_cast %198 : vector<1x4x128xbf16> to vector<4x128xbf16>
    %cst_222 = arith.constant dense<0.000000e+00> : vector<16x128xf32>
    %200 = tpu.matmul %35, %199, %cst_222 {dimension_numbers = #tpu.dot_dimension_numbers<[1], [0], [0], [1], [0, 0, 1, 1], [], []>} : vector<16x4xbf16>, vector<4x128xbf16>, vector<16x128xf32> -> vector<16x128xf32>
    %201 = arith.addf %197, %200 : vector<16x128xf32>
    %202 = vector.shape_cast %37 : vector<128xf32> to vector<1x128xf32>
    %203 = vector.broadcast %202 : vector<1x128xf32> to vector<16x128xf32>
    %204 = arith.addf %201, %203 : vector<16x128xf32>
    %cst_223 = arith.constant 0.000000e+00 : f32
    %205 = vector.broadcast %cst_223 : f32 to vector<16x128xf32>
    %206 = arith.maximumf %204, %205 : vector<16x128xf32>
    %c0_224 = arith.constant 0 : index
    %c3_225 = arith.constant 3 : index
    %c0_226 = arith.constant 0 : index
    %c0_227 = arith.constant 0 : index
    %207 = vector.load %arg10[%c0_224, %c3_225, %c0_226, %c0_227] : memref<1x4x16x128xf32, #tpu.memory_space<vmem>>, vector<1x1x16x128xf32>
    %208 = vector.shape_cast %207 : vector<1x1x16x128xf32> to vector<16x128xf32>
    %209 = vector.shape_cast %206 : vector<16x128xf32> to vector<1x1x16x128xf32>
    tpu.vector_store %arg10[%c0_224, %c3_225, %c0_226, %c0_227], %209 {strides = array<i32>} : memref<1x4x16x128xf32, #tpu.memory_space<vmem>>, vector<1x1x16x128xf32>,
    return
  }
  func.func @transform_0(%arg0: i32, %arg1: i32) -> (i32, i32, i32, i32) {
    %c4_i32 = arith.constant 4 : i32
    %0 = arith.muli %arg1, %c4_i32 : i32
    %c1_i32 = arith.constant 1 : i32
    %1 = arith.muli %0, %c1_i32 : i32
    %c0_i32 = arith.constant 0 : i32
    %2 = arith.addi %1, %c0_i32 : i32
    %c0_i32_0 = arith.constant 0 : i32
    %c0_i32_1 = arith.constant 0 : i32
    %c0_i32_2 = arith.constant 0 : i32
    return %arg0, %2, %c0_i32_0, %c0_i32_1 : i32, i32, i32, i32
  }
  func.func @transform_1(%arg0: i32, %arg1: i32) -> (i32, i32, i32, i32) {
    %c4_i32 = arith.constant 4 : i32
    %0 = arith.muli %arg1, %c4_i32 : i32
    %c1_i32 = arith.constant 1 : i32
    %1 = arith.muli %0, %c1_i32 : i32
    %c1_i32_0 = arith.constant 1 : i32
    %2 = arith.addi %1, %c1_i32_0 : i32
    %c0_i32 = arith.constant 0 : i32
    %c0_i32_1 = arith.constant 0 : i32
    %c0_i32_2 = arith.constant 0 : i32
    return %arg0, %2, %c0_i32, %c0_i32_1 : i32, i32, i32, i32
  }
  func.func @transform_2(%arg0: i32, %arg1: i32) -> (i32, i32, i32, i32) {
    %c4_i32 = arith.constant 4 : i32
    %0 = arith.muli %arg1, %c4_i32 : i32
    %c1_i32 = arith.constant 1 : i32
    %1 = arith.muli %0, %c1_i32 : i32
    %c2_i32 = arith.constant 2 : i32
    %2 = arith.addi %1, %c2_i32 : i32
    %c0_i32 = arith.constant 0 : i32
    %c0_i32_0 = arith.constant 0 : i32
    %c0_i32_1 = arith.constant 0 : i32
    return %arg0, %2, %c0_i32, %c0_i32_0 : i32, i32, i32, i32
  }
  func.func @transform_3(%arg0: i32, %arg1: i32) -> (i32, i32, i32, i32) {
    %c4_i32 = arith.constant 4 : i32
    %0 = arith.muli %arg1, %c4_i32 : i32
    %c1_i32 = arith.constant 1 : i32
    %1 = arith.muli %0, %c1_i32 : i32
    %c3_i32 = arith.constant 3 : i32
    %2 = arith.addi %1, %c3_i32 : i32
    %c0_i32 = arith.constant 0 : i32
    %c0_i32_0 = arith.constant 0 : i32
    %c0_i32_1 = arith.constant 0 : i32
    return %arg0, %2, %c0_i32, %c0_i32_0 : i32, i32, i32, i32
  }
  func.func @transform_4(%arg0: i32, %arg1: i32) -> (i32, i32, i32, i32) {
    %c4_i32 = arith.constant 4 : i32
    %0 = arith.muli %arg1, %c4_i32 : i32
    %c1_i32 = arith.constant 1 : i32
    %1 = arith.muli %0, %c1_i32 : i32
    %c4_i32_0 = arith.constant 4 : i32
    %2 = arith.addi %1, %c4_i32_0 : i32
    %c0_i32 = arith.constant 0 : i32
    %c0_i32_1 = arith.constant 0 : i32
    %c0_i32_2 = arith.constant 0 : i32
    return %arg0, %2, %c0_i32, %c0_i32_1 : i32, i32, i32, i32
  }
  func.func @transform_5(%arg0: i32, %arg1: i32) -> (i32, i32, i32, i32) {
    %c4_i32 = arith.constant 4 : i32
    %0 = arith.muli %arg1, %c4_i32 : i32
    %c1_i32 = arith.constant 1 : i32
    %1 = arith.muli %0, %c1_i32 : i32
    %c5_i32 = arith.constant 5 : i32
    %2 = arith.addi %1, %c5_i32 : i32
    %c0_i32 = arith.constant 0 : i32
    %c0_i32_0 = arith.constant 0 : i32
    %c0_i32_1 = arith.constant 0 : i32
    return %arg0, %2, %c0_i32, %c0_i32_0 : i32, i32, i32, i32
  }
  func.func @transform_6(%arg0: i32, %arg1: i32) -> (i32, i32, i32) {
    %c0_i32 = arith.constant 0 : i32
    %c0_i32_0 = arith.constant 0 : i32
    %c0_i32_1 = arith.constant 0 : i32
    %c0_i32_2 = arith.constant 0 : i32
    return %c0_i32, %c0_i32_0, %c0_i32_1 : i32, i32, i32
  }
  func.func @transform_7(%arg0: i32, %arg1: i32) -> (i32, i32) {
    %c0_i32 = arith.constant 0 : i32
    %c0_i32_0 = arith.constant 0 : i32
    %c0_i32_1 = arith.constant 0 : i32
    return %c0_i32, %c0_i32_0 : i32, i32
  }
  func.func @transform_8(%arg0: i32, %arg1: i32) -> (i32, i32, i32, i32) {
    %c0_i32 = arith.constant 0 : i32
    %c0_i32_0 = arith.constant 0 : i32
    %c0_i32_1 = arith.constant 0 : i32
    return %arg0, %arg1, %c0_i32, %c0_i32_0 : i32, i32, i32, i32
  }
}

</mosaic_0001>

<bundles_post_ra>
// kernel: conv_bn_act_block.1
= control target key start
LH: loop header
LB: loop body
LE: loop exit
PB: predicated region body
PF: predicated region fallthrough
CT: control target
= control target key end

     0   :  { %s3317_s27 = smov 0   ;;  %s3319_s28 = smov 0   ;;  %s3833_s0 = inlined_call_operand.vmem [shape: bf16[2,18,18,4], index: 0, kind: input, shape index: {}, may-alias: {0,1,2,3,4,5}]   ;;  %s3834_s1 = inlined_call_operand.vmem [shape: bf16[2,18,18,4], index: 1, kind: input, shape index: {}, may-alias: {0,1,2,3,4,5}]   ;;  %s3835_s2 = inlined_call_operand.vmem [shape: bf16[2,18,18,4], index: 2, kind: input, shape index: {}, may-alias: {0,1,2,3,4,5}]   ;;  %s3836_s3 = inlined_call_operand.vmem [shape: bf16[2,18,18,4], index: 3, kind: input, shape index: {}, may-alias: {0,1,2,3,4,5}]   ;;  %s3837_s4 = inlined_call_operand.vmem [shape: bf16[2,18,18,4], index: 4, kind: input, shape index: {}, may-alias: {0,1,2,3,4,5}]   ;;  %s3838_s5 = inlined_call_operand.vmem [shape: bf16[2,18,18,4], index: 5, kind: input, shape index: {}, may-alias: {0,1,2,3,4,5}]   ;;  %s3839_s6 = inlined_call_operand.vmem [shape: bf16[9,4,128], index: 6, kind: input, shape index: {}]   ;;  %s3840_s7 = inlined_call_operand.vmem [shape: f32[1,128], index: 7, kind: input, shape index: {}]   ;;  %s3841_s8 = inlined_call_operand.vmem [shape: f32[2,16,16,128], index: 8, kind: output, shape index: {}]  }
   0x1   :  { %s3321_s29 = smov 0   ;;  %s3323_s30 = smov 0  }
   0x2   :  { %s3325_s9 = smov 0  }
   0x3 LB: > { %s27_s10 = sadd.s32 1, %s3260_s29  ;;  %s30_s11 = sadd.s32 1, %s3264_s30  ;;  %s3268_s9 = sphi %s3325_s9, %s18_s9   ;;  %s3264_s30 = sphi %s3323_s30, %s3847_s30   ;;  %s3260_s29 = sphi %s3321_s29, %s3846_s29   ;;  %s3256_s28 = sphi %s3319_s28, %s3845_s28   ;;  %s3252_s27 = sphi %s3317_s27, %s3844_s27  }
   0x4   : > { %p28_p0 = scmp.ge.s32.totalorder %s27_s10, 4  ;;  %p2763_p1 = scmp.ge.s32.totalorder %s3268_s9, 1 }
   0x5   : > { %p406_p2 = scmp.lt.s32.totalorder %s3268_s9, 9 }
   0x6   : > { %s3849_s10 = smov (%p28_p0, %s27_s10), 0  ;;  %s3851_s11 = smov (!%p28_p0, %s30_s11), %s3264_s30 }
   0x7   : > { %p407_p3 = pnand %p2763_p1, %p406_p2  ;;  %p32_p4 = scmp.ge.s32.totalorder %s3851_s11, 2 }
   0x8   : > { %v2780_v0 = vld [vmem:[%s3839_s6 + $0x2] sm:$0x3] (!%p407_p3)  ;;  %vm646_vm0 = vcmask (!%p407_p3), 1041408   ;;  %v618_v1 = vld [vmem:[%s3839_s6] sm:$0x3] (!%p407_p3)  ;;  %v3270_v2 = vmov (!%p407_p3), 0.0  }
   0x9   : > { %s3853_s11 = smov (%p32_p4, %s3851_s11), 0  ;;  %410 = sbr.rel (%p407_p3) target bundleno = 393 (0x189), region = 52 }
   0xa   : > { %2947 = vmatprep.subr.bf16.mxu0 (!%p407_p3), %v3270_v2  ;;  %2953 = vmatprep.subr.bf16.mxu1 (!%p407_p3), %v3270_v2  ;;  %v648_v3 = vsel (!%p407_p3), %vm646_vm0, %v2780_v0, 0  ;;  %v694_v4 = vsel (!%p407_p3), %vm646_vm0, %v618_v1, 0  ;;  %s3359_s16 = sshll.u32 (!%p407_p3), %s3252_s27, 2  ;;  %p506_p5 = scmp.lt.s32.totalorder (!%p407_p3), %s3256_s28, 1  ;;  %vm3271_vm1 = vmmov (!%p407_p3), 0   ;;  %vm642_vm2 = vcmask (!%p407_p3), 31744  }
   0xb   : > { %2948 = vmatpush3.bf16.msra.mxu0 (!%p407_p3), %v648_v3  ;;  %2954 = vmatpush3.bf16.msra.mxu1 (!%p407_p3), %v694_v4  ;;  %p508_p6 = scmp.lt.s32.totalorder (!%p407_p3), %s3359_s16, 17  ;;  %s517_s17 = sadd.s32 (!%p407_p3), 1, %s3359_s16  ;;  %v2788_v5 = vld [vmem:[%s3839_s6 + $0x6] sm:$0x3] (!%p407_p3)  ;;  %v2785_v15 = vld [vmem:[%s3839_s6 + $0x4] sm:$0x3] (!%p407_p3) }
   0xc   : > { %2955 = vmatprep.mubr.msk.bf16.mxu1 (!%p407_p3), %vm3271_vm1, %v3270_v2  ;;  %2949 = vmatprep.mubr.msk.bf16.mxu0 (!%p407_p3), %vm3271_vm1, %v3270_v2  ;;  %p520_p7 = scmp.lt.s32.totalorder (!%p407_p3), %s517_s17, 17  ;;  %s530_s24 = sadd.s32 (!%p407_p3), 2, %s3359_s16  ;;  %v806_v8 = vsel (!%p407_p3), %vm646_vm0, %v2788_v5, 0  ;;  %vm629_vm3 = vsmask.f32 (!%p407_p3), 7424  ;;  %v750_v24 = vsel (!%p407_p3), %vm646_vm0, %v2785_v15, 0 }
   0xd   : > { %2959 = vmatprep.subr.bf16.mxu0 (!%p407_p3), %v3270_v2  ;;  %2965 = vmatprep.subr.bf16.mxu1 (!%p407_p3), %v3270_v2  ;;  %p3387_p8 = scmp.lt.s32.totalorder (!%p407_p3), %s530_s24, 17  ;;  %s543_s22 = sadd.s32 (!%p407_p3), 3, %s3359_s16  ;;  %v2794_v23 = vld [vmem:[%s3839_s6 + $0xa] sm:$0x3] (!%p407_p3)  ;;  %vm742_vm4 = vcmask (!%p407_p3), 1046528  }
   0xe   : > { %p546_p9 = scmp.lt.s32.totalorder (!%p407_p3), %s543_s22, 17  ;;  %v928_v31 = vsel (!%p407_p3), %vm646_vm0, %v2794_v23, 0  ;;  %v2791_v35 = vld [vmem:[%s3839_s6 + $0x8] sm:$0x3] (!%p407_p3)  ;;  %v2800_v40 = vld [vmem:[%s3839_s6 + $0xe] sm:$0x3] (!%p407_p3) }
   0xf   : > { %v871_v46 = vsel (!%p407_p3), %vm646_vm0, %v2791_v35, 0  ;;  %v1049_v51 = vsel (!%p407_p3), %vm646_vm0, %v2800_v40, 0  ;;  %v2797_v54 = vld [vmem:[%s3839_s6 + $0xc] sm:$0x3] (!%p407_p3)  ;;  %v2807_v58 = vld [vmem:[%s3839_s6 + $0x2] sm:$0x3] (!%p407_p3) }
  0x10   : > { %s3855_s28 = smov (!%p506_p5, %s3256_s28), 1  ;;  %s3857_s17 = smov (!%p520_p7, %s517_s17), 17  ;;  %v984_v59 = vsel %vm646_vm0, %v2797_v54, 0  ;;  %v1166_v63 = vsel %vm646_vm0, %v2807_v58, 0 }
  0x11   : > { %s509_s18 = scalar_select %p508_p6, %s3359_s16, 17 }
  0x12   : > { %s3375_s19 = smul.u32 54, %s3855_s28  ;;  %s3859_s24 = smov (!%p3387_p8, %s530_s24), 17 }
  0x13   : > { %s3163_s20 = smul.u32 3, %s509_s18  ;;  %s3861_s22 = smov (!%p546_p9, %s543_s22), 17 }
  0x14   : > { %s3165_s26 = smul.u32 3, %s3857_s17  ;;  %p584_p12 = scmp.lt.s32.totalorder %s3359_s16, 15 }
  0x15   : > { %s512_s21 = sadd.s32 %s3375_s19, %s3163_s20  ;;  %s3167_s15 = smul.u32 3, %s3861_s22 }
  0x16   : > { %s2765_s25 = sshll.u32 %s512_s21, 2  ;;  %s524_s14 = sadd.s32 %s3165_s26, %s3375_s19 }
  0x17   : > { %s514_s13 = scalar_lea.vmem %s3833_s0, %s2765_s25  ;;  %s2767_s18 = sshll.u32 %s524_s14, 2 }
  0x18   : > { %v593_v6 = vld [vmem:[%s514_s13] sm:$0xf]  ;;  %v594_v7 = vld [vmem:[%s514_s13 + $0x4] sm:$0xf]  ;;  %s526_s21 = scalar_lea.vmem %s3834_s1, %s2767_s18  ;;  %s3166_s26 = smul.u32 3, %s3859_s24 }
  0x19   : > { %v2781_v9 = vcombine.low %v593_v6, %v594_v7  ;;  %v3391_v10 = vld [vmem:[%s514_s13 + $0x8] ss:$0 sps:$4 sm:$0x11]   ;;  %v596_v11 = vld [vmem:[%s514_s13] sm:$0xe]  ;;  %s550_s20 = sadd.s32 %s3167_s15, %s3375_s19  ;;  %s556_s25 = sadd.s32 4, %s3359_s16 }
  0x1a   : > { %v638_v14 = vshll.u32 %v3391_v10, 16  ;;  %v597_v16 = vld [vmem:[%s526_s21] sm:$0xf]  ;;  %v598_v19 = vld [vmem:[%s526_s21 + $0x4] sm:$0xf]  ;;  %v2786_v20 = vcombine.low %v596_v11, %v594_v7  ;;  %s537_s13 = sadd.s32 %s3166_s26, %s3375_s19  ;;  %v744_v30 = vrot.slane %v3391_v10, 1 }
  0x1b   : > { %2956 = vmatmul.mubr.msk.bf16.vlgmr.msra.gmra.mrb[0].mxu1 %vm642_vm2, %v2781_v9  ;;  %v631_v12 = vshrl.u32 %v2781_v9, 16  ;;  %v633_v13 = vshll.u32 %v2781_v9, 16  ;;  %v600_v21 = vld [vmem:[%s526_s21] sm:$0xe]  ;;  %v3411_v25 = vcombine.low %v597_v16, %v598_v19  ;;  %s2769_s14 = sshll.u32 %s537_s13, 2  ;;  %s2771_s23 = sshll.u32 %s550_s20, 2 }
  0x1c   : > { %2966 = vmatpush3.bf16.msra.mxu1 %v806_v8  ;;  %2967 = vmatprep.mubr.msk.bf16.mxu1 %vm3271_vm1, %v3270_v2  ;;  %v640_v18 = vrot.slane %v638_v14, 1  ;;  %v3216_v27 = vld [vmem:[%s526_s21 + $0x8] ss:$0 sps:$4 sm:$0x11]   ;;  %v2795_v28 = vcombine.low %v600_v21, %v598_v19  ;;  %v743_v29 = vrot.slane %v2786_v20, 1  ;;  %s3422_s17 = scalar_lea.vmem %s3835_s2, %s2769_s14  ;;  %s3454_s14 = scalar_lea.vmem %s3836_s3, %s2771_s23 }
  0x1d   : > { %v635_v17 = vrot.slane %v633_v13, 1  ;;  %2977 = vmatprep.subr.bf16.mxu1 %v3270_v2  ;;  %v858_v32 = vshll.u32 %v3411_v25, 16  ;;  %v601_v33 = vld [vmem:[%s3422_s17] sm:$0xf]  ;;  %v3428_v34 = vld [vmem:[%s3422_s17 + $0x4] sm:$0xf] }
  0x1e   : > { %v3438_v36 = vcombine.low %v601_v33, %v3428_v34  ;;  %v921_v37 = vrot.slane %v2795_v28, 1  ;;  %v922_v38 = vrot.slane %v3216_v27, 1  ;;  %v3443_v39 = vld [vmem:[%s3422_s17 + $0x8] ss:$0 sps:$4 sm:$0x11]   ;;  %v745_v42 = vsel %vm742_vm4, %v743_v29, %v744_v30  ;;  %p559_p10 = scmp.lt.s32.totalorder %s556_s25, 17 }
  0x1f   : > { %v636_v22 = vor.u32 %v635_v17, %v631_v12  ;;  %v856_v43 = vshrl.u32 %v3411_v25, 16  ;;  %v860_v44 = vrot.slane %v858_v32, 1  ;;  %v863_v45 = vshll.u32 %v3216_v27, 16  ;;  %s569_s24 = sadd.s32 5, %s3359_s16  ;;  %v604_v5 = vld [vmem:[%s3422_s17] sm:$0xe] }
  0x20   : > { %v1036_v41 = vshll.u32 %v3438_v36, 16  ;;  %v3460_v47 = vsel %vm742_vm4, %v921_v37, %v922_v38  ;;  %v1034_v48 = vshrl.u32 %v3438_v36, 16  ;;  %v1041_v50 = vshll.u32 %v3443_v39, 16  ;;  %s3863_s25 = smov (!%p559_p10, %s556_s25), 17  ;;  %p3483_p11 = scmp.lt.s32.totalorder %s569_s24, 17 }
  0x21   : > { %v641_v26 = vsel %vm629_vm3, %v636_v22, %v640_v18  ;;  %v861_v52 = vor.u32 %v860_v44, %v856_v43  ;;  %v865_v53 = vrot.slane %v863_v45, 1  ;;  %s3168_s15 = smul.u32 3, %s3863_s25  ;;  %v2803_v10 = vld [vmem:[%s3839_s6 + $0x10] sm:$0x3]  ;;  %v2810_v12 = vld [vmem:[%s3839_s6 + $0x4] sm:$0x3]  ;;  %v2804_v15 = vcombine.low %v604_v5, %v3428_v34 }
  0x22   : > { %2950 = vmatmul.mubr.msk.bf16.vlgmr.msra.gmra.mrb[0].mxu0 %vm642_vm2, %v641_v26  ;;  %v1038_v49 = vrot.slane %v1036_v41, 1  ;;  %v1043_v56 = vrot.slane %v1041_v50, 1  ;;  %s3865_s24 = smov (!%p3483_p11, %s569_s24), 17  ;;  %v1106_v17 = vsel %vm646_vm0, %v2803_v10, 0  ;;  %v1100_v19 = vrot.slane %v3443_v39, 1  ;;  %s3867_s16 = smov (!%p584_p12, %s3359_s16), 15 }
  0x23   : > { %2960 = vmatpush3.bf16.msra.mxu0 %v750_v24  ;;  %2961 = vmatprep.mubr.msk.bf16.mxu0 %vm3271_vm1, %v3270_v2  ;;  %s563_s21 = sadd.s32 %s3168_s15, %s3375_s19  ;;  %v866_v57 = vsel %vm629_vm3, %v861_v52, %v865_v53  ;;  %s3169_s20 = smul.u32 3, %s3865_s24  ;;  %v1255_v20 = vsel %vm646_vm0, %v2810_v12, 0  ;;  %v1099_v24 = vrot.slane %v2804_v15, 1  ;;  %v1163_v30 = vld [vmem:[%s3839_s6] sm:$0x3] }
  0x24   : > { %2968 = vmatmul.mubr.msk.bf16.vlgmr.msra.gmra.mrb[4].mxu1 %vm642_vm2, %v3411_v25  ;;  %2971 = vmatprep.subr.bf16.mxu0 %v3270_v2  ;;  %v1039_v55 = vor.u32 %v1038_v49, %v1034_v48  ;;  %s2773_s25 = sshll.u32 %s563_s21, 2  ;;  %v2814_v38 = vld [vmem:[%s3839_s6 + $0x8] sm:$0x3]  ;;  %v1210_v41 = vsel %vm646_vm0, %v1163_v30, 0  ;;  %v2818_v48 = vld [vmem:[%s3839_s6 + $0xc] sm:$0x3] }
  0x25   : > { %2978 = vmatpush3.bf16.msra.mxu1 %v928_v31  ;;  %2979 = vmatprep.mubr.msk.bf16.mxu1 %vm3271_vm1, %v3270_v2  ;;  %s565_s13 = scalar_lea.vmem %s3837_s4, %s2773_s25  ;;  %s576_s22 = sadd.s32 %s3169_s20, %s3375_s19  ;;  %v3548_v37 = vsel %vm742_vm4, %v1099_v24, %v1100_v19  ;;  %v1349_v44 = vsel %vm646_vm0, %v2814_v38, 0  ;;  %v1451_v49 = vsel %vm646_vm0, %v2818_v48, 0  ;;  %v2816_v50 = vld [vmem:[%s3839_s6 + $0xa] sm:$0x3]  ;;  %v608_v52 = vld [vmem:[%s3454_s14] sm:$0xe] }
  0x26   : > { %2989 = vmatprep.subr.bf16.mxu1 %v3270_v2  ;;  %v3492_v60 = vsel %vm629_vm3, %v1039_v55, %v1043_v56  ;;  %v609_v61 = vld [vmem:[%s565_s13] sm:$0xf]  ;;  %v610_v62 = vld [vmem:[%s565_s13 + $0x4] sm:$0xf]  ;;  %s2775_s23 = sshll.u32 %s576_s22, 2  ;;  %v1396_v54 = vsel %vm646_vm0, %v2816_v50, 0 }
  0x27   : > { %v3496_v0 = vcombine.low %v609_v61, %v610_v62  ;;  %v3225_v1 = vld [vmem:[%s565_s13 + $0x8] ss:$0 sps:$4 sm:$0x11]   ;;  %v612_v3 = vld [vmem:[%s565_s13] sm:$0xe]  ;;  %s578_s26 = scalar_lea.vmem %s3838_s5, %s2775_s23  ;;  %s2777_s18 = sshll.u32 %s3867_s16, 1 }
  0x28   : > { %v2847_v4 = vcombine.low %v612_v3, %v610_v62  ;;  %v1967_v8 = vshll.u32 %v3225_v1, 16  ;;  %v2025_v9 = vrot.slane %v3225_v1, 1  ;;  %v613_v22 = vld [vmem:[%s578_s26] sm:$0xf]  ;;  %v614_v23 = vld [vmem:[%s578_s26 + $0x4] sm:$0xf] }
  0x29   : > { %v1960_v6 = vshrl.u32 %v3496_v0, 16  ;;  %v1962_v7 = vshll.u32 %v3496_v0, 16  ;;  %v3535_v26 = vcombine.low %v613_v22, %v614_v23  ;;  %v616_v27 = vld [vmem:[%s578_s26] sm:$0xe]  ;;  %v2824_v53 = vld [vmem:[%s3839_s6 + $0x10] sm:$0x3] }
  0x2a   : > { %2962 = vmatmul.mubr.msk.bf16.vlgmr.msra.gmra.mrb[4].mxu0 %vm642_vm2, %v745_v42  ;;  %v2024_v11 = vrot.slane %v2847_v4, 1  ;;  %v1969_v14 = vrot.slane %v1967_v8, 1  ;;  %v3228_v28 = vld [vmem:[%s578_s26 + $0x8] ss:$0 sps:$4 sm:$0x11]   ;;  %v2869_v29 = vcombine.low %v616_v27, %v614_v23  ;;  %v1571_v58 = vsel %vm646_vm0, %v2824_v53, 0 }
  0x2b   : > { %2972 = vmatpush3.bf16.msra.mxu0 %v871_v46  ;;  %2973 = vmatprep.mubr.msk.bf16.mxu0 %vm3271_vm1, %v3270_v2  ;;  %v1964_v13 = vrot.slane %v1962_v7, 1  ;;  %v2485_v31 = vrot.slane %v3228_v28, 1  ;;  %v2420_v32 = vshrl.u32 %v3535_v26, 16  ;;  %v2422_v33 = vshll.u32 %v3535_v26, 16  ;;  %v2812_v46 = vld [vmem:[%s3839_s6 + $0x6] sm:$0x3] }
  0x2c   : > { %2980 = vmatmul.mubr.msk.bf16.vlgmr.msra.gmra.mrb[8].mxu1 %vm642_vm2, %v3460_v47  ;;  %2983 = vmatprep.subr.bf16.mxu0 %v3270_v2  ;;  %v3519_v16 = vsel %vm742_vm4, %v2024_v11, %v2025_v9  ;;  %v2427_v34 = vshll.u32 %v3228_v28, 16  ;;  %v2484_v35 = vrot.slane %v2869_v29, 1  ;;  %v3222_v56 = vld [vmem:[%s3454_s14 + $0x8] ss:$0 sps:$4 sm:$0x11]   ;;  %s2778_s20 = sshll.u32 %s3855_s28, 5 }
  0x2d   : > { %2990 = vmatpush3.bf16.msra.mxu1 %v1049_v51  ;;  %2991 = vmatprep.mubr.msk.bf16.mxu1 %vm3271_vm1, %v3270_v2  ;;  %v1965_v18 = vor.u32 %v1964_v13, %v1960_v6  ;;  %v2424_v39 = vrot.slane %v2422_v33, 1  ;;  %v606_v51 = vld [vmem:[%s3454_s14 + $0x4] sm:$0xf]  ;;  %v2821_v61 = vld [vmem:[%s3839_s6 + $0xe] sm:$0x3]  ;;  %v1507_v4 = vshll.u32 %v3222_v56, 16  ;;  %s588_s17 = sadd.s32 %s2778_s20, %s2777_s18 }
  0x2e   : > { %3001 = vmatprep.subr.bf16.mxu1 %v3270_v2  ;;  %v2429_v40 = vrot.slane %v2427_v34, 1  ;;  %v3555_v42 = vsel %vm742_vm4, %v2484_v35, %v2485_v31  ;;  %v1623_v5 = vld [vmem:[%s3839_s6] sm:$0x3]  ;;  %v1515_v6 = vsel %vm646_vm0, %v2821_v61, 0  ;;  %v2829_v11 = vld [vmem:[%s3839_s6 + $0x2] sm:$0x3] }
  0x2f   : > { %v3531_v21 = vsel %vm629_vm3, %v1965_v18, %v1969_v14  ;;  %v2425_v43 = vor.u32 %v2424_v39, %v2420_v32  ;;  %v1670_v8 = vsel %vm646_vm0, %v1623_v5, 0  ;;  %v1509_v10 = vrot.slane %v1507_v4, 1  ;;  %v2834_v13 = vld [vmem:[%s3839_s6 + $0x6] sm:$0x3]  ;;  %v2838_v18 = vld [vmem:[%s3839_s6 + $0xa] sm:$0x3] }
  0x30   : > { %v1626_v14 = vsel %vm646_vm0, %v2829_v11, 0  ;;  %v1762_v15 = vsel %vm646_vm0, %v2834_v13, 0  ;;  %v2840_v24 = vld [vmem:[%s3839_s6 + $0xc] sm:$0x3]  ;;  %v2851_v27 = vld [vmem:[%s3839_s6 + $0x2] sm:$0x3] }
  0x31   : > { %v3563_v45 = vsel %vm629_vm3, %v2425_v43, %v2429_v40  ;;  %v1911_v28 = vsel %vm646_vm0, %v2840_v24, 0  ;;  %v2086_v29 = vsel %vm646_vm0, %v2851_v27, 0  ;;  %v2846_v30 = vld [vmem:[%s3839_s6 + $0x10] sm:$0x3]  ;;  %v2854_v31 = vld [vmem:[%s3839_s6 + $0x4] sm:$0x3] }
  0x32   : > { %2974 = vmatmul.mubr.msk.bf16.vlgmr.msra.gmra.mrb[8].mxu0 %vm642_vm2, %v866_v57  ;;  %v2031_v32 = vsel %vm646_vm0, %v2846_v30, 0  ;;  %v2175_v33 = vsel %vm646_vm0, %v2854_v31, 0  ;;  %v2083_v34 = vld [vmem:[%s3839_s6] sm:$0x3]  ;;  %v2858_v35 = vld [vmem:[%s3839_s6 + $0x8] sm:$0x3] }
  0x33   : > { %2984 = vmatpush3.bf16.msra.mxu0 %v984_v59  ;;  %2985 = vmatprep.mubr.msk.bf16.mxu0 %vm3271_vm1, %v3270_v2  ;;  %v2269_v38 = vsel %vm646_vm0, %v2858_v35, 0  ;;  %v2856_v39 = vld [vmem:[%s3839_s6 + $0x6] sm:$0x3]  ;;  %v2862_v40 = vld [vmem:[%s3839_s6 + $0xc] sm:$0x3]  ;;  %s2779_s23 = sshll.u32 %s588_s17, 3 }
  0x34   : > { %2992 = vmatmul.mubr.msk.bf16.vlgmr.msra.gmra.mrb[12].mxu1 %vm642_vm2, %v3492_v60  ;;  %2995 = vmatprep.subr.bf16.mxu0 %v3270_v2  ;;  %v2371_v43 = vsel %vm646_vm0, %v2862_v40, 0  ;;  %s3801_s24 = scalar_lea.vmem %s3841_s8, %s2779_s23 }
  0x35   : > { %3002 = vmatpush3.bf16.msra.mxu1 %v1166_v63  ;;  %3003 = vmatprep.mubr.msk.bf16.mxu1 %vm3271_vm1, %v3270_v2  ;;  %v1565_v63 = vrot.slane %v3222_v56, 1 }
  0x36   : > { %3013 = vmatprep.subr.bf16.mxu1 %v3270_v2 }
  0x3a   : > { %2986 = vmatmul.mubr.msk.bf16.vlgmr.msra.gmra.mrb[12].mxu0 %vm642_vm2, %v3438_v36 }
  0x3b   : > { %2996 = vmatpush3.bf16.msra.mxu0 %v1106_v17  ;;  %2997 = vmatprep.mubr.msk.bf16.mxu0 %vm3271_vm1, %v3270_v2  ;;  %v2832_v17 = vld [vmem:[%s3839_s6 + $0x4] sm:$0x3] }
  0x3c   : > { %3004 = vmatmul.mubr.msk.bf16.vlgmr.msra.gmra.mrb[16].mxu1 %vm642_vm2, %v866_v57  ;;  %3007 = vmatprep.subr.bf16.mxu0 %v3270_v2  ;;  %v2825_v57 = vcombine.low %v608_v52, %v606_v51  ;;  %v1715_v19 = vsel %vm646_vm0, %v2832_v17, 0 }
  0x3d   : > { %3014 = vmatpush3.bf16.msra.mxu1 %v1255_v20  ;;  %3015 = vmatprep.mubr.msk.bf16.mxu1 %vm3271_vm1, %v3270_v2  ;;  %v2836_v20 = vld [vmem:[%s3839_s6 + $0x8] sm:$0x3] }
  0x3e   : > { %3025 = vmatprep.subr.bf16.mxu1 %v3270_v2  ;;  %v1564_v62 = vrot.slane %v2825_v57, 1  ;;  %v1809_v22 = vsel %vm646_vm0, %v2836_v20, 0 }
  0x40   : > { %v3623_v7 = vsel %vm742_vm4, %v1564_v62, %v1565_v63 }
  0x42   : > { %2998 = vmatmul.mubr.msk.bf16.vlgmr.msra.gmra.mrb[16].mxu0 %vm642_vm2, %v3548_v37 }
  0x43   : > { %3008 = vmatpush3.bf16.msra.mxu0 %v1210_v41  ;;  %3009 = vmatprep.mubr.msk.bf16.mxu0 %vm3271_vm1, %v3270_v2  ;;  %v2222_v41 = vsel %vm646_vm0, %v2856_v39, 0 }
  0x44   : > { %3016 = vmatmul.mubr.msk.bf16.vlgmr.msra.gmra.mrb[20].mxu1 %vm642_vm2, %v3460_v47  ;;  %3019 = vmatprep.subr.bf16.mxu0 %v3270_v2  ;;  %v1302_v47 = vsel %vm646_vm0, %v2812_v46, 0  ;;  %v2868_v46 = vld [vmem:[%s3839_s6 + $0x10] sm:$0x3] }
  0x45   : > { %3026 = vmatpush3.bf16.msra.mxu1 %v1349_v44  ;;  %3027 = vmatprep.mubr.msk.bf16.mxu1 %vm3271_vm1, %v3270_v2  ;;  %v2860_v44 = vld [vmem:[%s3839_s6 + $0xa] sm:$0x3] }
  0x46   : > { %3037 = vmatprep.subr.bf16.mxu1 %v3270_v2  ;;  %v2316_v48 = vsel %vm646_vm0, %v2860_v44, 0 }
  0x4a   : > { %3010 = vmatmul.mubr.msk.bf16.vlgmr.msra.gmra.mrb[20].mxu0 %vm642_vm2, %v3411_v25  ;;  %v605_v25 = vld [vmem:[%s3454_s14] sm:$0xf] }
  0x4b   : > { %3020 = vmatpush3.bf16.msra.mxu0 %v1302_v47  ;;  %3021 = vmatprep.mubr.msk.bf16.mxu0 %vm3271_vm1, %v3270_v2  ;;  %v3599_v55 = vcombine.low %v605_v25, %v606_v51  ;;  %v2865_v47 = vld [vmem:[%s3839_s6 + $0xe] sm:$0x3] }
  0x4c   : > { %3028 = vmatmul.mubr.msk.bf16.vlgmr.msra.gmra.mrb[24].mxu1 %vm642_vm2, %v3492_v60  ;;  %3031 = vmatprep.subr.bf16.mxu0 %v3270_v2 }
  0x4d   : > { %3038 = vmatpush3.bf16.msra.mxu1 %v1451_v49  ;;  %3039 = vmatprep.mubr.msk.bf16.mxu1 %vm3271_vm1, %v3270_v2  ;;  %v1502_v59 = vshll.u32 %v3599_v55, 16  ;;  %v1500_v1 = vshrl.u32 %v3599_v55, 16 }
  0x4e   : > { %3049 = vmatprep.subr.bf16.mxu1 %v3270_v2 }
  0x4f   : > { %v1504_v3 = vrot.slane %v1502_v59, 1 }
  0x51   : > { %v1505_v9 = vor.u32 %v1504_v3, %v1500_v1 }
  0x52   : > { %3022 = vmatmul.mubr.msk.bf16.vlgmr.msra.gmra.mrb[24].mxu0 %vm642_vm2, %v3438_v36 }
  0x53   : > { %3032 = vmatpush3.bf16.msra.mxu0 %v1396_v54  ;;  %3033 = vmatprep.mubr.msk.bf16.mxu0 %vm3271_vm1, %v3270_v2  ;;  %v1510_v12 = vsel %vm629_vm3, %v1505_v9, %v1509_v10 }
  0x54   : > { %3040 = vmatmul.mubr.msk.bf16.vlgmr.msra.gmra.mrb[28].mxu1 %vm642_vm2, %v3599_v55  ;;  %3043 = vmatprep.subr.bf16.mxu0 %v3270_v2 }
  0x55   : > { %3050 = vmatpush3.bf16.msra.mxu1 %v1571_v58  ;;  %3051 = vmatprep.mubr.msk.bf16.mxu1 %vm3271_vm1, %v3270_v2 }
  0x56   : > { %3061 = vmatprep.subr.bf16.mxu1 %v3270_v2 }
  0x5a   : > { %3034 = vmatmul.mubr.msk.bf16.vlgmr.msra.gmra.mrb[28].mxu0 %vm642_vm2, %v3548_v37 }
  0x5b   : > { %3044 = vmatpush3.bf16.msra.mxu0 %v1515_v6  ;;  %3045 = vmatprep.mubr.msk.bf16.mxu0 %vm3271_vm1, %v3270_v2 }
  0x5c   : > { %3052 = vmatmul.mubr.msk.bf16.vlgmr.msra.gmra.mrb[32].mxu1 %vm642_vm2, %v3623_v7  ;;  %3055 = vmatprep.subr.bf16.mxu0 %v3270_v2 }
  0x5d   : > { %3062 = vmatpush3.bf16.msra.mxu1 %v1670_v8  ;;  %3063 = vmatprep.mubr.msk.bf16.mxu1 %vm3271_vm1, %v3270_v2 }
  0x5e   : > { %3073 = vmatprep.subr.bf16.mxu1 %v3270_v2 }
  0x62   : > { %3046 = vmatmul.mubr.msk.bf16.vlgmr.msra.gmra.mrb[32].mxu0 %vm642_vm2, %v1510_v12 }
  0x63   : > { %3056 = vmatpush3.bf16.msra.mxu0 %v1626_v14  ;;  %3057 = vmatprep.mubr.msk.bf16.mxu0 %vm3271_vm1, %v3270_v2 }
  0x64   : > { %3064 = vmatmul.mubr.msk.bf16.vlgmr.msra.gmra.mrb[36].mxu1 %vm642_vm2, %v3438_v36  ;;  %3067 = vmatprep.subr.bf16.mxu0 %v3270_v2  ;;  %v1856_v36 = vsel %vm646_vm0, %v2838_v18, 0 }
  0x65   : > { %3074 = vmatpush3.bf16.msra.mxu1 %v1762_v15  ;;  %3075 = vmatprep.mubr.msk.bf16.mxu1 %vm3271_vm1, %v3270_v2 }
  0x66   : > { %3085 = vmatprep.subr.bf16.mxu1 %v3270_v2 }
  0x6a   : > { %3058 = vmatmul.mubr.msk.bf16.vlgmr.msra.gmra.mrb[36].mxu0 %vm642_vm2, %v3492_v60  ;;  %v2843_v60 = vld [vmem:[%s3839_s6 + $0xe] sm:$0x3] }
  0x6b   : > { %3068 = vmatpush3.bf16.msra.mxu0 %v1715_v19  ;;  %3069 = vmatprep.mubr.msk.bf16.mxu0 %vm3271_vm1, %v3270_v2  ;;  %v1975_v23 = vsel %vm646_vm0, %v2843_v60, 0 }
  0x6c   : > { %3076 = vmatmul.mubr.msk.bf16.vlgmr.msra.gmra.mrb[40].mxu1 %vm642_vm2, %v3599_v55  ;;  %3079 = vmatprep.subr.bf16.mxu0 %v3270_v2 }
  0x6d   : > { %3086 = vmatpush3.bf16.msra.mxu1 %v1856_v36  ;;  %3087 = vmatprep.mubr.msk.bf16.mxu1 %vm3271_vm1, %v3270_v2 }
  0x6e   : > { %3097 = vmatprep.subr.bf16.mxu1 %v3270_v2 }
  0x72   : > { %3070 = vmatmul.mubr.msk.bf16.vlgmr.msra.gmra.mrb[40].mxu0 %vm642_vm2, %v3548_v37  ;;  %v2130_v37 = vsel %vm646_vm0, %v2083_v34, 0  ;;  %v3795_v34 = vld [vmem:[%s3840_s7] ss:$0 sm:$0xff] }
  0x73   : > { %3080 = vmatpush3.bf16.msra.mxu0 %v1809_v22  ;;  %3081 = vmatprep.mubr.msk.bf16.mxu0 %vm3271_vm1, %v3270_v2 }
  0x74   : > { %3088 = vmatmul.mubr.msk.bf16.vlgmr.msra.gmra.mrb[44].mxu1 %vm642_vm2, %v3623_v7  ;;  %3091 = vmatprep.subr.bf16.mxu0 %v3270_v2 }
  0x75   : > { %3098 = vmatpush3.bf16.msra.mxu1 %v1975_v23  ;;  %3099 = vmatprep.mubr.msk.bf16.mxu1 %vm3271_vm1, %v3270_v2 }
  0x76   : > { %3109 = vmatprep.subr.bf16.mxu1 %v3270_v2 }
  0x7a   : > { %3082 = vmatmul.mubr.msk.bf16.vlgmr.msra.gmra.mrb[44].mxu0 %vm642_vm2, %v1510_v12 }
  0x7b   : > { %3092 = vmatpush3.bf16.msra.mxu0 %v1911_v28  ;;  %3093 = vmatprep.mubr.msk.bf16.mxu0 %vm3271_vm1, %v3270_v2 }
  0x7c   : > { %3100 = vmatmul.mubr.msk.bf16.vlgmr.msra.gmra.mrb[48].mxu1 %vm642_vm2, %v3531_v21  ;;  %3103 = vmatprep.subr.bf16.mxu0 %v3270_v2 }
  0x7d   : > { %3110 = vmatpush3.bf16.msra.mxu1 %v2086_v29  ;;  %3111 = vmatprep.mubr.msk.bf16.mxu1 %vm3271_vm1, %v3270_v2 }
  0x7e   : > { %3121 = vmatprep.subr.bf16.mxu1 %v3270_v2 }
  0x82   : > { %3094 = vmatmul.mubr.msk.bf16.vlgmr.msra.gmra.mrb[48].mxu0 %vm642_vm2, %v3496_v0 }
  0x83   : > { %3104 = vmatpush3.bf16.msra.mxu0 %v2031_v32  ;;  %3105 = vmatprep.mubr.msk.bf16.mxu0 %vm3271_vm1, %v3270_v2 }
  0x84   : > { %3112 = vmatmul.mubr.msk.bf16.vlgmr.msra.gmra.mrb[52].mxu1 %vm642_vm2, %v1510_v12  ;;  %3115 = vmatprep.subr.bf16.mxu0 %v3270_v2 }
  0x85   : > { %3122 = vmatpush3.bf16.msra.mxu1 %v2175_v33  ;;  %3123 = vmatprep.mubr.msk.bf16.mxu1 %vm3271_vm1, %v3270_v2 }
  0x86   : > { %3133 = vmatprep.subr.bf16.mxu1 %v3270_v2 }
  0x8a   : > { %3106 = vmatmul.mubr.msk.bf16.vlgmr.msra.gmra.mrb[52].mxu0 %vm642_vm2, %v3519_v16 }
  0x8b   : > { %3116 = vmatpush3.bf16.msra.mxu0 %v2130_v37  ;;  %3117 = vmatprep.mubr.msk.bf16.mxu0 %vm3271_vm1, %v3270_v2 }
  0x8c   : > { %3124 = vmatmul.mubr.msk.bf16.vlgmr.msra.gmra.mrb[56].mxu1 %vm642_vm2, %v3623_v7  ;;  %3127 = vmatprep.subr.bf16.mxu0 %v3270_v2 }
  0x8d   : > { %3134 = vmatpush3.bf16.msra.mxu1 %v2269_v38  ;;  %3135 = vmatprep.mubr.msk.bf16.mxu1 %vm3271_vm1, %v3270_v2 }
  0x8e   : > { %3145 = vmatprep.subr.bf16.mxu1 %v3270_v2 }
  0x92   : > { %3118 = vmatmul.mubr.msk.bf16.vlgmr.msra.gmra.mrb[56].mxu0 %vm642_vm2, %v3599_v55 }
  0x93   : > { %3128 = vmatpush3.bf16.msra.mxu0 %v2222_v41  ;;  %3129 = vmatprep.mubr.msk.bf16.mxu0 %vm3271_vm1, %v3270_v2 }
  0x94   : > { %3136 = vmatmul.mubr.msk.bf16.vlgmr.msra.gmra.mrb[60].mxu1 %vm642_vm2, %v3531_v21  ;;  %3139 = vmatprep.subr.bf16.mxu0 %v3270_v2  ;;  %v2491_v21 = vsel %vm646_vm0, %v2868_v46, 0 }
  0x95   : > { %3146 = vmatpush3.bf16.msra.mxu1 %v2371_v43  ;;  %3147 = vmatprep.mubr.msk.bf16.mxu1 %vm3271_vm1, %v3270_v2 }
  0x96   : > { %3157 = vmatprep.subr.bf16.mxu1 %v3270_v2 }
  0x9a   : > { %3130 = vmatmul.mubr.msk.bf16.vlgmr.msra.gmra.mrb[60].mxu0 %vm642_vm2, %v3496_v0  ;;  %v2435_v0 = vsel %vm646_vm0, %v2865_v47, 0 }
  0x9b   : > { %3140 = vmatpush3.bf16.msra.mxu0 %v2316_v48  ;;  %3141 = vmatprep.mubr.msk.bf16.mxu0 %vm3271_vm1, %v3270_v2 }
  0x9c   : > { %3148 = vmatmul.mubr.msk.bf16.vlgmr.msra.gmra.mrb[64].mxu1 %vm642_vm2, %v3535_v26  ;;  %3151 = vmatprep.subr.bf16.mxu0 %v3270_v2 }
  0x9d   : > { %3158 = vmatpush3.bf16.msra.mxu1 %v2491_v21  ;;  %3159 = vmatprep.mubr.msk.bf16.mxu1 %vm3271_vm1, %v3270_v2 }
  0xa2   : > { %3142 = vmatmul.mubr.msk.bf16.vlgmr.msra.gmra.mrb[64].mxu0 %vm642_vm2, %v3519_v16 }
  0xa3   : > { %3152 = vmatpush3.bf16.msra.mxu0 %v2435_v0  ;;  %3153 = vmatprep.mubr.msk.bf16.mxu0 %vm3271_vm1, %v3270_v2 }
  0xa4   : > { %3160 = vmatmul.mubr.msk.bf16.vlgmr.msra.gmra.mrb[68].mxu1 %vm642_vm2, %v3555_v42 }
  0xaa   : > { %3154 = vmatmul.mubr.msk.bf16.vlgmr.msra.gmra.mrb[68].mxu0 %vm642_vm2, %v3563_v45 }
  0xee   : > { %v730_v26 = vpop.f32.mrb[0].mxu1 }
  0xef   : > { %v2957_v49 = vpop.f32.mrb[1].mxu1 }
  0xf0   : > { %v733_v50 = vpop.f32.mrb[2].mxu1 }
  0xf1   : > { %v2958_v25 = vpop.f32.mrb[3].mxu1 }
  0xf5   : > { %v684_v51 = vpop.f32.mrb[0].mxu0 }
  0xf6   : > { %v731_v52 = vadd.f32 %v730_v26, %v684_v51  ;;  %v2951_v53 = vpop.f32.mrb[1].mxu0 }
  0xf7   : > { %v687_v54 = vpop.f32.mrb[2].mxu0  ;;  %v842_v55 = vpop.f32.mrb[4].mxu1 }
  0xf8   : > { %v734_v16 = vadd.f32 %v733_v50, %v687_v54  ;;  %v2952_v56 = vpop.f32.mrb[3].mxu0  ;;  %v2969_v57 = vpop.f32.mrb[5].mxu1 }
  0xf9   : > { %v845_v58 = vpop.f32.mrb[6].mxu1 }
  0xfa   : > { %v2970_v2 = vpop.f32.mrb[7].mxu1 }
  0xfd   : > { %v786_v59 = vpop.f32.mrb[4].mxu0 }
  0xfe   : > { %v793_v61 = vadd.f32 %v786_v59, %v731_v52  ;;  %v2963_v42 = vpop.f32.mrb[5].mxu0 }
  0xff   : > { %v789_v62 = vpop.f32.mrb[6].mxu0  ;;  %v964_v63 = vpop.f32.mrb[8].mxu1 }
 0x100   : > { %v794_v45 = vadd.f32 %v789_v62, %v734_v16  ;;  %v2964_v1 = vpop.f32.mrb[7].mxu0  ;;  %v849_v3 = vadd.f32 %v842_v55, %v793_v61  ;;  %v2981_v4 = vpop.f32.mrb[9].mxu1 }
 0x101   : > { %v967_v5 = vpop.f32.mrb[10].mxu1 }
 0x102   : > { %v850_v6 = vadd.f32 %v845_v58, %v794_v45  ;;  %v2982_v7 = vpop.f32.mrb[11].mxu1 }
 0x105   : > { %v907_v8 = vpop.f32.mrb[8].mxu0 }
 0x106   : > { %v914_v9 = vadd.f32 %v907_v8, %v849_v3  ;;  %v2975_v10 = vpop.f32.mrb[9].mxu0 }
 0x107   : > { %v910_v11 = vpop.f32.mrb[10].mxu0  ;;  %v1085_v12 = vpop.f32.mrb[12].mxu1 }
 0x108   : > { %v915_v13 = vadd.f32 %v910_v11, %v850_v6  ;;  %v2976_v14 = vpop.f32.mrb[11].mxu0  ;;  %v971_v15 = vadd.f32 %v964_v63, %v914_v9  ;;  %v2993_v17 = vpop.f32.mrb[13].mxu1 }
 0x109   : > { %v1088_v18 = vpop.f32.mrb[14].mxu1 }
 0x10a   : > { %v972_v19 = vadd.f32 %v967_v5, %v915_v13  ;;  %v2994_v36 = vpop.f32.mrb[15].mxu1 }
 0x10d   : > { %v1020_v20 = vpop.f32.mrb[12].mxu0 }
 0x10e   : > { %v1027_v60 = vadd.f32 %v1020_v20, %v971_v15  ;;  %v2987_v22 = vpop.f32.mrb[13].mxu0 }
 0x10f   : > { %v1023_v23 = vpop.f32.mrb[14].mxu0  ;;  %v1202_v24 = vpop.f32.mrb[16].mxu1 }
 0x110   : > { %v1028_v27 = vadd.f32 %v1023_v23, %v972_v19  ;;  %v2988_v28 = vpop.f32.mrb[15].mxu0  ;;  %v1092_v29 = vadd.f32 %v1085_v12, %v1027_v60  ;;  %v3005_v30 = vpop.f32.mrb[17].mxu1 }
 0x111   : > { %v1205_v31 = vpop.f32.mrb[18].mxu1 }
 0x112   : > { %v1093_v32 = vadd.f32 %v1088_v18, %v1028_v27  ;;  %v3006_v33 = vpop.f32.mrb[19].mxu1 }
 0x115   : > { %v1142_v35 = vpop.f32.mrb[16].mxu0 }
 0x116   : > { %v1149_v37 = vadd.f32 %v1142_v35, %v1092_v29  ;;  %v2999_v38 = vpop.f32.mrb[17].mxu0 }
 0x117   : > { %v1145_v39 = vpop.f32.mrb[18].mxu0  ;;  %v1291_v40 = vpop.f32.mrb[20].mxu1 }
 0x118   : > { %v1157_v41 = vadd.f32 %v3795_v34, %v1149_v37  ;;  %v1150_v43 = vadd.f32 %v1145_v39, %v1093_v32  ;;  %v3000_v44 = vpop.f32.mrb[19].mxu0  ;;  %v3017_v46 = vpop.f32.mrb[21].mxu1 }
 0x119   : > { %v1294_v48 = vpop.f32.mrb[22].mxu1 }
 0x11a   : > { %v1159_v21 = vmax.f32 %v1157_v41, 0.0  ;;  %v1158_v47 = vadd.f32 %v3795_v34, %v1150_v43  ;;  %v3018_v0 = vpop.f32.mrb[23].mxu1 }
 0x11c   : > { %1161 = vst [vmem:[%s3801_s24] sm:$0xff] %v1159_v21  ;;  %v1160_v26 = vmax.f32 %v1158_v47, 0.0 }
 0x11d   : > { %v1246_v49 = vpop.f32.mrb[20].mxu0 }
 0x11e   : > { %1162 = vst [vmem:[%s3801_s24 + $0x8] sm:$0xff] %v1160_v26  ;;  %v1247_v50 = vadd.f32 %v1246_v49, %v1202_v24  ;;  %v3011_v25 = vpop.f32.mrb[21].mxu0 }
 0x11f   : > { %v1249_v51 = vpop.f32.mrb[22].mxu0  ;;  %v1385_v52 = vpop.f32.mrb[24].mxu1 }
 0x120   : > { %v1250_v53 = vadd.f32 %v1249_v51, %v1205_v31  ;;  %v3012_v54 = vpop.f32.mrb[23].mxu0  ;;  %v1298_v55 = vadd.f32 %v1291_v40, %v1247_v50  ;;  %v3029_v16 = vpop.f32.mrb[25].mxu1 }
 0x121   : > { %v1388_v56 = vpop.f32.mrb[26].mxu1 }
 0x122   : > { %v1299_v57 = vadd.f32 %v1294_v48, %v1250_v53  ;;  %v3030_v58 = vpop.f32.mrb[27].mxu1 }
 0x125   : > { %v1338_v2 = vpop.f32.mrb[24].mxu0 }
 0x126   : > { %v1345_v59 = vadd.f32 %v1338_v2, %v1298_v55  ;;  %v3023_v61 = vpop.f32.mrb[25].mxu0 }
 0x127   : > { %v1341_v42 = vpop.f32.mrb[26].mxu0  ;;  %v1487_v62 = vpop.f32.mrb[28].mxu1 }
 0x128   : > { %v1346_v63 = vadd.f32 %v1341_v42, %v1299_v57  ;;  %v3024_v45 = vpop.f32.mrb[27].mxu0  ;;  %v1392_v1 = vadd.f32 %v1385_v52, %v1345_v59  ;;  %v3041_v3 = vpop.f32.mrb[29].mxu1 }
 0x129   : > { %v1490_v4 = vpop.f32.mrb[30].mxu1 }
 0x12a   : > { %v1393_v5 = vadd.f32 %v1388_v56, %v1346_v63  ;;  %v3042_v6 = vpop.f32.mrb[31].mxu1 }
 0x12d   : > { %v1432_v7 = vpop.f32.mrb[28].mxu0 }
 0x12e   : > { %v1439_v8 = vadd.f32 %v1432_v7, %v1392_v1  ;;  %v3035_v9 = vpop.f32.mrb[29].mxu0 }
 0x12f   : > { %v1435_v10 = vpop.f32.mrb[30].mxu0  ;;  %v1607_v11 = vpop.f32.mrb[32].mxu1 }
 0x130   : > { %v1440_v12 = vadd.f32 %v1435_v10, %v1393_v5  ;;  %v3036_v13 = vpop.f32.mrb[31].mxu0  ;;  %v1494_v14 = vadd.f32 %v1487_v62, %v1439_v8  ;;  %v3053_v15 = vpop.f32.mrb[33].mxu1 }
 0x131   : > { %v1610_v17 = vpop.f32.mrb[34].mxu1 }
 0x132   : > { %v1495_v18 = vadd.f32 %v1490_v4, %v1440_v12  ;;  %v3054_v19 = vpop.f32.mrb[35].mxu1 }
 0x135   : > { %v1551_v36 = vpop.f32.mrb[32].mxu0 }
 0x136   : > { %v1558_v20 = vadd.f32 %v1551_v36, %v1494_v14  ;;  %v3047_v60 = vpop.f32.mrb[33].mxu0 }
 0x137   : > { %v1554_v22 = vpop.f32.mrb[34].mxu0  ;;  %v1706_v23 = vpop.f32.mrb[36].mxu1 }
 0x138   : > { %v1614_v24 = vadd.f32 %v1607_v11, %v1558_v20  ;;  %v1559_v27 = vadd.f32 %v1554_v22, %v1495_v18  ;;  %v3048_v28 = vpop.f32.mrb[35].mxu0  ;;  %v3065_v29 = vpop.f32.mrb[37].mxu1 }
 0x139   : > { %v1709_v30 = vpop.f32.mrb[38].mxu1 }
 0x13a   : > { %v1616_v31 = vadd.f32 %v3795_v34, %v1614_v24  ;;  %v1615_v32 = vadd.f32 %v1610_v17, %v1559_v27  ;;  %v3066_v33 = vpop.f32.mrb[39].mxu1 }
 0x13c   : > { %v1618_v35 = vmax.f32 %v1616_v31, 0.0  ;;  %v1617_v37 = vadd.f32 %v3795_v34, %v1615_v32 }
 0x13d   : > { %v1662_v38 = vpop.f32.mrb[36].mxu0 }
 0x13e   : > { %2827 = vst [vmem:[%s3801_s24 + $0x10] sm:$0xff] %v1618_v35  ;;  %v1619_v39 = vmax.f32 %v1617_v37, 0.0  ;;  %v1707_v40 = vadd.f32 %v1706_v23, %v1662_v38  ;;  %v3059_v41 = vpop.f32.mrb[37].mxu0 }
 0x13f   : > { %v1665_v43 = vpop.f32.mrb[38].mxu0  ;;  %v1798_v44 = vpop.f32.mrb[40].mxu1 }
 0x140   : > { %2828 = vst [vmem:[%s3801_s24 + $0x18] sm:$0xff] %v1619_v39  ;;  %v1710_v46 = vadd.f32 %v1709_v30, %v1665_v43  ;;  %v3060_v48 = vpop.f32.mrb[39].mxu0  ;;  %v3077_v21 = vpop.f32.mrb[41].mxu1 }
 0x141   : > { %v1801_v47 = vpop.f32.mrb[42].mxu1 }
 0x142   : > { %v3078_v0 = vpop.f32.mrb[43].mxu1 }
 0x145   : > { %v1751_v26 = vpop.f32.mrb[40].mxu0 }
 0x146   : > { %v1758_v49 = vadd.f32 %v1751_v26, %v1707_v40  ;;  %v3071_v50 = vpop.f32.mrb[41].mxu0 }
 0x147   : > { %v1754_v25 = vpop.f32.mrb[42].mxu0  ;;  %v1892_v51 = vpop.f32.mrb[44].mxu1 }
 0x148   : > { %v1759_v52 = vadd.f32 %v1754_v25, %v1710_v46  ;;  %v3072_v53 = vpop.f32.mrb[43].mxu0  ;;  %v1805_v54 = vadd.f32 %v1798_v44, %v1758_v49  ;;  %v3089_v55 = vpop.f32.mrb[45].mxu1 }
 0x149   : > { %v1895_v16 = vpop.f32.mrb[46].mxu1 }
 0x14a   : > { %v1806_v56 = vadd.f32 %v1801_v47, %v1759_v52  ;;  %v3090_v57 = vpop.f32.mrb[47].mxu1 }
 0x14d   : > { %v1845_v58 = vpop.f32.mrb[44].mxu0 }
 0x14e   : > { %v1852_v2 = vadd.f32 %v1845_v58, %v1805_v54  ;;  %v3083_v59 = vpop.f32.mrb[45].mxu0 }
 0x14f   : > { %v1848_v61 = vpop.f32.mrb[46].mxu0  ;;  %v2011_v42 = vpop.f32.mrb[48].mxu1 }
 0x150   : > { %v1853_v62 = vadd.f32 %v1848_v61, %v1806_v56  ;;  %v3084_v63 = vpop.f32.mrb[47].mxu0  ;;  %v1899_v45 = vadd.f32 %v1892_v51, %v1852_v2  ;;  %v3101_v1 = vpop.f32.mrb[49].mxu1 }
 0x151   : > { %v2014_v3 = vpop.f32.mrb[50].mxu1 }
 0x152   : > { %v1900_v4 = vadd.f32 %v1895_v16, %v1853_v62  ;;  %v3102_v5 = vpop.f32.mrb[51].mxu1 }
 0x155   : > { %v1947_v6 = vpop.f32.mrb[48].mxu0 }
 0x156   : > { %v1954_v7 = vadd.f32 %v1947_v6, %v1899_v45  ;;  %v3095_v8 = vpop.f32.mrb[49].mxu0 }
 0x157   : > { %v1950_v9 = vpop.f32.mrb[50].mxu0  ;;  %v2122_v10 = vpop.f32.mrb[52].mxu1 }
 0x158   : > { %v1955_v11 = vadd.f32 %v1950_v9, %v1900_v4  ;;  %v3096_v12 = vpop.f32.mrb[51].mxu0  ;;  %v2018_v13 = vadd.f32 %v2011_v42, %v1954_v7  ;;  %v3113_v14 = vpop.f32.mrb[53].mxu1 }
 0x159   : > { %v2125_v15 = vpop.f32.mrb[54].mxu1 }
 0x15a   : > { %v2019_v17 = vadd.f32 %v2014_v3, %v1955_v11  ;;  %v3114_v18 = vpop.f32.mrb[55].mxu1 }
 0x15d   : > { %v2067_v19 = vpop.f32.mrb[52].mxu0 }
 0x15e   : > { %v2074_v36 = vadd.f32 %v2067_v19, %v2018_v13  ;;  %v3107_v20 = vpop.f32.mrb[53].mxu0 }
 0x15f   : > { %v2070_v60 = vpop.f32.mrb[54].mxu0  ;;  %v2211_v22 = vpop.f32.mrb[56].mxu1 }
 0x160   : > { %v2076_v23 = vadd.f32 %v3795_v34, %v2074_v36  ;;  %v2075_v24 = vadd.f32 %v2070_v60, %v2019_v17  ;;  %v3108_v27 = vpop.f32.mrb[55].mxu0  ;;  %v3125_v28 = vpop.f32.mrb[57].mxu1 }
 0x161   : > { %v2214_v29 = vpop.f32.mrb[58].mxu1 }
 0x162   : > { %v2078_v30 = vmax.f32 %v2076_v23, 0.0  ;;  %v2077_v31 = vadd.f32 %v3795_v34, %v2075_v24  ;;  %v3126_v32 = vpop.f32.mrb[59].mxu1 }
 0x164   : > { %2849 = vst [vmem:[%s3801_s24 + $0x20] sm:$0xff] %v2078_v30  ;;  %v2079_v33 = vmax.f32 %v2077_v31, 0.0 }
 0x165   : > { %v2166_v35 = vpop.f32.mrb[56].mxu0 }
 0x166   : > { %2850 = vst [vmem:[%s3801_s24 + $0x28] sm:$0xff] %v2079_v33  ;;  %v2167_v37 = vadd.f32 %v2166_v35, %v2122_v10  ;;  %v3119_v38 = vpop.f32.mrb[57].mxu0 }
 0x167   : > { %v2169_v39 = vpop.f32.mrb[58].mxu0  ;;  %v2305_v40 = vpop.f32.mrb[60].mxu1 }
 0x168   : > { %v2170_v41 = vadd.f32 %v2169_v39, %v2125_v15  ;;  %v3120_v43 = vpop.f32.mrb[59].mxu0  ;;  %v2218_v44 = vadd.f32 %v2211_v22, %v2167_v37  ;;  %v3137_v46 = vpop.f32.mrb[61].mxu1 }
 0x169   : > { %v2308_v48 = vpop.f32.mrb[62].mxu1 }
 0x16a   : > { %v2219_v21 = vadd.f32 %v2214_v29, %v2170_v41  ;;  %v3138_v47 = vpop.f32.mrb[63].mxu1 }
 0x16d   : > { %v2258_v0 = vpop.f32.mrb[60].mxu0 }
 0x16e   : > { %v2265_v26 = vadd.f32 %v2258_v0, %v2218_v44  ;;  %v3131_v49 = vpop.f32.mrb[61].mxu0 }
 0x16f   : > { %v2261_v50 = vpop.f32.mrb[62].mxu0  ;;  %v2407_v25 = vpop.f32.mrb[64].mxu1 }
 0x170   : > { %v2266_v51 = vadd.f32 %v2261_v50, %v2219_v21  ;;  %v3132_v52 = vpop.f32.mrb[63].mxu0  ;;  %v2312_v53 = vadd.f32 %v2305_v40, %v2265_v26  ;;  %v3149_v54 = vpop.f32.mrb[65].mxu1 }
 0x171   : > { %v2410_v55 = vpop.f32.mrb[66].mxu1 }
 0x172   : > { %v2313_v16 = vadd.f32 %v2308_v48, %v2266_v51  ;;  %v3150_v56 = vpop.f32.mrb[67].mxu1 }
 0x175   : > { %v2352_v57 = vpop.f32.mrb[64].mxu0 }
 0x176   : > { %v2359_v58 = vadd.f32 %v2352_v57, %v2312_v53  ;;  %v3143_v2 = vpop.f32.mrb[65].mxu0 }
 0x177   : > { %v2355_v59 = vpop.f32.mrb[66].mxu0  ;;  %v2527_v61 = vpop.f32.mrb[68].mxu1 }
 0x178   : > { %v2360_v42 = vadd.f32 %v2355_v59, %v2313_v16  ;;  %v3144_v62 = vpop.f32.mrb[67].mxu0  ;;  %v2414_v63 = vadd.f32 %v2407_v25, %v2359_v58  ;;  %v3161_v45 = vpop.f32.mrb[69].mxu1 }
 0x179   : > { %v2530_v1 = vpop.f32.mrb[70].mxu1 }
 0x17a   : > { %v2415_v3 = vadd.f32 %v2410_v55, %v2360_v42  ;;  %v3162_v4 = vpop.f32.mrb[71].mxu1 }
 0x17d   : > { %v2471_v5 = vpop.f32.mrb[68].mxu0 }
 0x17e   : > { %v2478_v6 = vadd.f32 %v2471_v5, %v2414_v63  ;;  %v3155_v7 = vpop.f32.mrb[69].mxu0 }
 0x17f   : > { %v2474_v8 = vpop.f32.mrb[70].mxu0 }
 0x180   : > { %v2534_v9 = vadd.f32 %v2527_v61, %v2478_v6  ;;  %v2479_v10 = vadd.f32 %v2474_v8, %v2415_v3  ;;  %v3156_v11 = vpop.f32.mrb[71].mxu0 }
 0x182   : > { %v2536_v12 = vadd.f32 %v3795_v34, %v2534_v9  ;;  %v2535_v13 = vadd.f32 %v2530_v1, %v2479_v10 }
 0x184   : > { %v2538_v14 = vmax.f32 %v2536_v12, 0.0  ;;  %v2537_v15 = vadd.f32 %v3795_v34, %v2535_v13 }
 0x186   : > { %2871 = vst [vmem:[%s3801_s24 + $0x30] sm:$0xff] %v2538_v14  ;;  %v2539_v17 = vmax.f32 %v2537_v15, 0.0 }
 0x188   : > { %2872 = vst [vmem:[%s3801_s24 + $0x38] sm:$0xff] %v2539_v17 }
 0x189 PF: > { %s18_s9 = sadd.s32 1, %s3268_s9   ;;  %s3844_s27 = smov %s3260_s29 }
 0x18a   : > { %p15_p13 = scmp.ge.s32.totalorder %s18_s9, 10   ;;  %s3845_s28 = smov %s3264_s30 }
 0x18b   : > { %s3846_s29 = smov %s3849_s10  ;;  %s3847_s30 = smov %s3853_s11 }
 0x18c   :  { %17 = sbr.rel (!%p15_p13) target bundleno = 3 (0x3), region = 108 }

</bundles_post_ra>
